<compile_context>
chip_gen: v7x
topology: tpu7x:2x2x1
jax: 0.10.0
libtpu: 0.0.40
codegen_flags: <defaults>
</compile_context>

<pallas_src>
import functools
import numpy as np

import jax
import jax.numpy as jnp
from jax import lax
from jax.experimental import pallas as pl
from jax.experimental.pallas import tpu as pltpu

EPS = 1e-5


def _conv_kernel(L, nf, G, n_groups, pad,
                 x_ref, wb_ref, wg_ref, wm_ref,
                 y_ref, ps_ref, pss_ref,
                 xg, xmp, acc):
    """Per-batch-tile conv phase.

    x_ref : (TB, L, ni)   bf16 input tile
    wb_ref: (ni, nf)      bf16 bottleneck 1x1 weight
    wg_ref: (n_groups, G*nf, 4nf) bf16 grouped fused conv weights (maxpool slot 0)
    wm_ref: (ni, 4nf)     bf16 widened maxpool 1x1 weight (cols [0:3nf] zero)
    y_ref : (TB*L, 4nf)   f32 pre-BN activations (output tile)
    ps_ref: (1, 8, 4nf)   f32 per-tile partial sum (sublane-partial)
    pss_ref:(1, 8, 4nf)   f32 per-tile partial sum of squares
    xg    : (TB, Lg, G*nf) f32 VMEM scratch: xg[b, m, j*nf:(j+1)*nf] = xpad[b, m+j]
    xmp   : (TB, L+2, ni)  f32 VMEM scratch: -inf padded input for the maxpool
    acc   : (TB*L, 4nf)    f32 VMEM scratch accumulator
    """
    TB, _, ni = x_ref.shape
    C4 = wm_ref.shape[1]

    xv = x_ref[...]                                         # (TB, L, ni) bf16
    x2 = xv.reshape(TB * L, ni)

    # ---- bottleneck 1x1 conv (bf16 MXU, f32 accumulate) --------------------
    xb = jnp.dot(x2, wb_ref[...], preferred_element_type=jnp.float32)
    xb3 = xb.reshape(TB, L, nf)                             # (TB, L, nf) f32

    # ---- build the grouped-im2col buffer ------------------------------------
    # xpad is the bottleneck activation zero-padded by `pad` at the front:
    # xg[b, m, j*nf:(j+1)*nf] = xpad[b, m + j].  All slices below are static.
    xg[...] = jnp.zeros_like(xg)
    for j in range(G):
        xg[:, pad - j:pad - j + L, j * nf:(j + 1) * nf] = xb3

    # ---- MaxPool1d(3, stride=1, pad=1) branch + widened 1x1 conv ------------
    # TODO(synk): for deep blocks (ni == 4nf) this path is already lane-dense;
    #             for tiny ni it is lane-sparse but negligible in cost.
    xmp[:, 0:1, :] = jnp.full((TB, 1, ni), -jnp.inf, jnp.float32)
    xmp[:, L + 1:L + 2, :] = jnp.full((TB, 1, ni), -jnp.inf, jnp.float32)
    xmp[:, 1:L + 1, :] = xv.astype(jnp.float32)
    mp = jnp.maximum(jnp.maximum(xmp[:, 0:L, :], xmp[:, 1:L + 1, :]),
                     xmp[:, 2:L + 2, :])                    # (TB, L, ni) f32
    # wm_ref's first 3*nf columns are zero, so this directly initializes the
    # dense (TB*L, 4nf) accumulator with the maxpool branch in its channel slot.
    acc[...] = jnp.dot(mp.reshape(TB * L, ni).astype(jnp.bfloat16), wm_ref[...],
                       preferred_element_type=jnp.float32)

    # ---- fused 39/19/9 "same" convs: one K = G*nf matmul per tap group ------
    for g in range(n_groups):                               # fully unrolled
        lhs = xg[:, g * G:g * G + L, :].reshape(TB * L, G * nf)
        acc[...] += jnp.dot(lhs.astype(jnp.bfloat16), wg_ref[g],
                            preferred_element_type=jnp.float32)

    # ---- write pre-BN activations + per-tile BN partials ---------------------
    y = acc[...]                                            # (TB*L, 4nf) f32
    y_ref[...] = y
    y3 = y.reshape(TB * L // 8, 8, C4)
    ps_ref[...] = jnp.sum(y3, axis=0, keepdims=True)        # (1, 8, 4nf)
    pss_ref[...] = jnp.sum(y3 * y3, axis=0, keepdims=True)


def _bn_relu_kernel(inv_n, y_ref, ps_ref, pss_ref, g_ref, b_ref, o_ref):
    """BN finalize + affine + ReLU over one row tile of the pre-BN activations."""
    ps = ps_ref[...]
    pss = pss_ref[...]
    n_rows = ps.shape[0] * ps.shape[1]
    s = jnp.sum(ps.reshape(n_rows, ps.shape[2]), axis=0, keepdims=True)    # (1, 4nf)
    ss = jnp.sum(pss.reshape(n_rows, pss.shape[2]), axis=0, keepdims=True)
    mean = s * inv_n
    # Single-pass biased variance (E[y^2] - mean^2) in f32.
    # TODO(synk): switch to Welford/two-pass combine if tighter accuracy is needed.
    var = jnp.maximum(ss * inv_n - mean * mean, 0.0)
    scale = g_ref[...] * lax.rsqrt(var + EPS)
    shift = b_ref[...] - mean * scale
    o_ref[...] = jnp.maximum(y_ref[...] * scale + shift, 0.0)


def inception_module(x_ncl, wb, wconvs, wm, gamma, beta, *, group=8):
    """Wrapper.  x_ncl: (B, ni, L); weights in PyTorch layout (Cout, Cin, K)."""
    B, ni, L = x_ncl.shape
    nf = wb.shape[0]
    C4 = 4 * nf
    assert L % 8 == 0, "sequence length must be a multiple of 8"

    kss = tuple(int(w.shape[-1]) for w in wconvs)
    k_max = max(kss)
    pad = (k_max - 1) // 2
    G = max(1, min(group, pad + 1))                         # in-group tap count
    n_groups = -(-k_max // G)
    n_taps = n_groups * G                                   # zero-padded tap count
    Lg = max((n_groups - 1) * G, pad) + L
    Lg = ((Lg + 7) // 8) * 8                                # padded im2col length

    # ---- glue: channels-last bf16 activation, grouped tap-major weights ------
    x_cl = jnp.transpose(x_ncl, (0, 2, 1)).astype(jnp.bfloat16)        # (B, L, ni)
    wb_k = jnp.transpose(wb[:, :, 0], (1, 0)).astype(jnp.bfloat16)     # (ni, nf)

    # Fused per-tap conv weight (n_taps, nf, 4nf): 39/19/9 kernels centered,
    # tap >= k_max and the maxpool channel slot (cols 3nf:4nf) stay zero.
    wtap = jnp.zeros((n_taps, nf, C4), jnp.float32)
    for idx, w in enumerate(wconvs):
        k = int(w.shape[-1])
        off = (k_max - k) // 2                              # center the kernel
        wt = jnp.transpose(w, (2, 1, 0)).astype(jnp.float32)            # (k, Cin, Cout)
        wtap = wtap.at[off:off + k, :, idx * nf:(idx + 1) * nf].set(wt)
    wg = wtap.reshape(n_groups, G * nf, C4).astype(jnp.bfloat16)        # grouped

    # Widened maxpool 1x1 weight: (ni, 4nf), only cols [3nf:4nf] non-zero.
    wm_wide = jnp.zeros((ni, C4), jnp.float32)
    wm_wide = wm_wide.at[:, 3 * nf:].set(jnp.transpose(wm[:, :, 0], (1, 0)))
    wm_wide = wm_wide.astype(jnp.bfloat16)

    g2 = gamma.reshape(1, C4).astype(jnp.float32)
    b2 = beta.reshape(1, C4).astype(jnp.float32)

    # ---- pass 1: conv branches + per-tile BN partials (tiled over batch) -----
    # TODO(synk): also tile over L (with a +/- pad halo) for very long sequences;
    #             batch tiling alone bounds VMEM to O(L * channels) per step.
    TB = 1
    n_bt = B // TB
    kernel1 = functools.partial(_conv_kernel, L, nf, G, n_groups, pad)

    grid_spec1 = pltpu.PrefetchScalarGridSpec(
        num_scalar_prefetch=0,
        grid=(n_bt,),
        in_specs=[
            pl.BlockSpec((TB, L, ni), lambda i: (i, 0, 0)),
            pl.BlockSpec((ni, nf), lambda i: (0, 0)),
            pl.BlockSpec((n_groups, G * nf, C4), lambda i: (0, 0, 0)),
            pl.BlockSpec((ni, C4), lambda i: (0, 0)),
        ],
        out_specs=[
            pl.BlockSpec((TB * L, C4), lambda i: (i, 0)),
            pl.BlockSpec((1, 8, C4), lambda i: (i, 0, 0)),
            pl.BlockSpec((1, 8, C4), lambda i: (i, 0, 0)),
        ],
        scratch_shapes=[
            pltpu.VMEM((TB, Lg, G * nf), jnp.float32),      # xg (grouped im2col)
            pltpu.VMEM((TB, L + 2, ni), jnp.float32),       # xmp (-inf padded)
            pltpu.VMEM((TB * L, C4), jnp.float32),          # accumulator
        ],
    )

    y, ps, pss = pl.pallas_call(
        kernel1,
        out_shape=(jax.ShapeDtypeStruct((B * L, C4), jnp.float32),
                   jax.ShapeDtypeStruct((n_bt, 8, C4), jnp.float32),
                   jax.ShapeDtypeStruct((n_bt, 8, C4), jnp.float32)),
        grid_spec=grid_spec1,
        compiler_params=pltpu.CompilerParams(
            dimension_semantics=("parallel",),
            vmem_limit_bytes=64 * 1024 * 1024),
    )(x_cl, wb_k, wg, wm_wide)

    # ---- pass 2: BN finalize (mean/var from partials) + affine + ReLU --------
    # TODO(synk): BatchNorm running_mean/running_var buffer updates (training
    #             bookkeeping) are not emitted; they don't affect this output.
    kernel2 = functools.partial(_bn_relu_kernel, float(1.0 / (B * L)))
    TR = TB * L
    grid_spec2 = pltpu.PrefetchScalarGridSpec(
        num_scalar_prefetch=0,
        grid=(n_bt,),
        in_specs=[
            pl.BlockSpec((TR, C4), lambda i: (i, 0)),
            pl.BlockSpec((n_bt, 8, C4), lambda i: (0, 0, 0)),
            pl.BlockSpec((n_bt, 8, C4), lambda i: (0, 0, 0)),
            pl.BlockSpec((1, C4), lambda i: (0, 0)),
            pl.BlockSpec((1, C4), lambda i: (0, 0)),
        ],
        out_specs=pl.BlockSpec((TR, C4), lambda i: (i, 0)),
    )
    out2d = pl.pallas_call(
        kernel2,
        out_shape=jax.ShapeDtypeStruct((B * L, C4), jnp.float32),
        grid_spec=grid_spec2,
        compiler_params=pltpu.CompilerParams(
            dimension_semantics=("parallel",),
            vmem_limit_bytes=64 * 1024 * 1024),
    )(y, ps, pss, g2, b2)

    return jnp.transpose(out2d.reshape(B, L, C4), (0, 2, 1))            # (B, 4nf, L)


def ref_forward(x_ncl, wb, wconvs, wm, gamma, beta):
    """Pure-JAX reference matching PyTorch training-mode forward (NCL layout)."""
    dn = ('NCH', 'OIH', 'NCH')
    xb = lax.conv_general_dilated(x_ncl, wb, (1,), [(0, 0)], dimension_numbers=dn)
    branches = []
    for w in wconvs:
        pad = (w.shape[-1] - 1) // 2
        branches.append(lax.conv_general_dilated(xb, w, (1,), [(pad, pad)],
                                                 dimension_numbers=dn))
    mp = lax.reduce_window(x_ncl, -jnp.inf, lax.max,
                           (1, 1, 3), (1, 1, 1), [(0, 0), (0, 0), (1, 1)])
    branches.append(lax.conv_general_dilated(mp, wm, (1,), [(0, 0)],
                                             dimension_numbers=dn))
    y = jnp.concatenate(branches, axis=1)                               # (B, 4nf, L)
    mean = jnp.mean(y, axis=(0, 2), keepdims=True)
    var = jnp.mean((y - mean) ** 2, axis=(0, 2), keepdims=True)
    yhat = (y - mean) * lax.rsqrt(var + EPS)
    out = yhat * gamma[None, :, None] + beta[None, :, None]
    return jnp.maximum(out, 0.0)


if __name__ == "__main__":
    # Small but module-consistent shapes: ni=4, nf=32 (default), ks=40 (default),
    # so kernel sizes are [39, 19, 9] and the output has 4*nf = 128 channels.
    B, ni, L = 2, 4, 64
    nf, ks = 32, 40
    kss = [ks // 2 ** i for i in range(3)]
    kss = [k if k % 2 != 0 else k - 1 for k in kss]                     # [39, 19, 9]

    key = jax.random.PRNGKey(0)
    kx, kb, k0, k1, k2, km, kg, kbe = jax.random.split(key, 8)
    x = jax.random.normal(kx, (B, ni, L), jnp.float32)
    wb = 0.2 * jax.random.normal(kb, (nf, ni, 1), jnp.float32)          # bottleneck
    wconvs = [0.05 * jax.random.normal(kk, (nf, nf, kz), jnp.float32)
              for kk, kz in zip((k0, k1, k2), kss)]
    wm = 0.2 * jax.random.normal(km, (nf, ni, 1), jnp.float32)          # maxpool conv
    gamma = 1.0 + 0.1 * jax.random.normal(kg, (4 * nf,), jnp.float32)
    beta = 0.1 * jax.random.normal(kbe, (4 * nf,), jnp.float32)

    out = inception_module(x, wb, wconvs, wm, gamma, beta)
    out = jax.block_until_ready(out)
    assert out.shape == (B, 4 * nf, L) and out.dtype == jnp.float32

    ref = ref_forward(x, wb, wconvs, wm, gamma, beta)
    np.testing.assert_allclose(np.asarray(out), np.asarray(ref), rtol=2e-2, atol=2e-2)

    print("KERNEL_OK")
</pallas_src>

<mosaic_0001>
module attributes {stable_mosaic.version = 11 : i64} {
  func.func @_conv_kernel(%arg0: i32, %arg1: memref<1x64x4xbf16, #tpu.memory_space<vmem>>, %arg2: memref<4x32xbf16, #tpu.memory_space<vmem>>, %arg3: memref<5x256x128xbf16, #tpu.memory_space<vmem>>, %arg4: memref<4x128xbf16, #tpu.memory_space<vmem>>, %arg5: memref<64x128xf32, #tpu.memory_space<vmem>>, %arg6: memref<1x8x128xf32, #tpu.memory_space<vmem>>, %arg7: memref<1x8x128xf32, #tpu.memory_space<vmem>>, %arg8: memref<1x96x256xf32, #tpu.memory_space<vmem>>, %arg9: memref<1x66x4xf32, #tpu.memory_space<vmem>>, %arg10: memref<64x128xf32, #tpu.memory_space<vmem>>) attributes {dimension_semantics = [#tpu.dimension_semantics<parallel>], iteration_bounds = array<i64: 2>, scalar_prefetch = 0 : i64, scratch_operands = 3 : i64, tpu.core_type = #tpu.core_type<tc>, window_params = [{transform_indices = @transform_0, window_bounds = array<i64: 1, 64, 4>}, {pipeline_mode = #tpu.pipeline_mode<synchronous>, transform_indices = @transform_1, window_bounds = array<i64: 4, 32>}, {pipeline_mode = #tpu.pipeline_mode<synchronous>, transform_indices = @transform_2, window_bounds = array<i64: 5, 256, 128>}, {pipeline_mode = #tpu.pipeline_mode<synchronous>, transform_indices = @transform_3, window_bounds = array<i64: 4, 128>}, {transform_indices = @transform_4, window_bounds = array<i64: 64, 128>}, {transform_indices = @transform_5, window_bounds = array<i64: 1, 8, 128>}, {transform_indices = @transform_6, window_bounds = array<i64: 1, 8, 128>}]} {
    %c0 = arith.constant 0 : index
    %c0_0 = arith.constant 0 : index
    %c0_1 = arith.constant 0 : index
    %0 = vector.load %arg1[%c0, %c0_0, %c0_1] : memref<1x64x4xbf16, #tpu.memory_space<vmem>>, vector<1x64x4xbf16>
    %1 = vector.shape_cast %0 : vector<1x64x4xbf16> to vector<64x4xbf16>
    %c0_2 = arith.constant 0 : index
    %c0_3 = arith.constant 0 : index
    %2 = vector.load %arg2[%c0_2, %c0_3] : memref<4x32xbf16, #tpu.memory_space<vmem>>, vector<4x32xbf16>
    %cst = arith.constant dense<0.000000e+00> : vector<64x32xf32>
    %3 = tpu.matmul %1, %2, %cst {dimension_numbers = #tpu.dot_dimension_numbers<[1], [0], [0], [1], [0, 0, 1, 1], [], []>} : vector<64x4xbf16>, vector<4x32xbf16>, vector<64x32xf32> -> vector<64x32xf32>
    %4 = vector.shape_cast %3 : vector<64x32xf32> to vector<1x64x32xf32>
    %cst_4 = arith.constant 0.000000e+00 : f32
    %5 = vector.broadcast %cst_4 : f32 to vector<1x96x256xf32>
    %c0_5 = arith.constant 0 : index
    %c0_6 = arith.constant 0 : index
    %c0_7 = arith.constant 0 : index
    %6 = vector.load %arg8[%c0_5, %c0_6, %c0_7] : memref<1x96x256xf32, #tpu.memory_space<vmem>>, vector<1x96x256xf32>
    tpu.vector_store %arg8[%c0_5, %c0_6, %c0_7], %5 {strides = array<i32>} : memref<1x96x256xf32, #tpu.memory_space<vmem>>, vector<1x96x256xf32>,
    %c0_8 = arith.constant 0 : index
    %c19 = arith.constant 19 : index
    %c0_9 = arith.constant 0 : index
    %7 = vector.load %arg8[%c0_8, %c19, %c0_9] : memref<1x96x256xf32, #tpu.memory_space<vmem>>, vector<1x64x32xf32>
    tpu.vector_store %arg8[%c0_8, %c19, %c0_9], %4 {strides = array<i32>} : memref<1x96x256xf32, #tpu.memory_space<vmem>>, vector<1x64x32xf32>,
    %c0_10 = arith.constant 0 : index
    %c18 = arith.constant 18 : index
    %c32 = arith.constant 32 : index
    %8 = vector.load %arg8[%c0_10, %c18, %c32] : memref<1x96x256xf32, #tpu.memory_space<vmem>>, vector<1x64x32xf32>
    tpu.vector_store %arg8[%c0_10, %c18, %c32], %4 {strides = array<i32>} : memref<1x96x256xf32, #tpu.memory_space<vmem>>, vector<1x64x32xf32>,
    %c0_11 = arith.constant 0 : index
    %c17 = arith.constant 17 : index
    %c64 = arith.constant 64 : index
    %9 = vector.load %arg8[%c0_11, %c17, %c64] : memref<1x96x256xf32, #tpu.memory_space<vmem>>, vector<1x64x32xf32>
    tpu.vector_store %arg8[%c0_11, %c17, %c64], %4 {strides = array<i32>} : memref<1x96x256xf32, #tpu.memory_space<vmem>>, vector<1x64x32xf32>,
    %c0_12 = arith.constant 0 : index
    %c16 = arith.constant 16 : index
    %c96 = arith.constant 96 : index
    %10 = vector.load %arg8[%c0_12, %c16, %c96] : memref<1x96x256xf32, #tpu.memory_space<vmem>>, vector<1x64x32xf32>
    tpu.vector_store %arg8[%c0_12, %c16, %c96], %4 {strides = array<i32>} : memref<1x96x256xf32, #tpu.memory_space<vmem>>, vector<1x64x32xf32>,
    %c0_13 = arith.constant 0 : index
    %c15 = arith.constant 15 : index
    %c128 = arith.constant 128 : index
    %11 = vector.load %arg8[%c0_13, %c15, %c128] : memref<1x96x256xf32, #tpu.memory_space<vmem>>, vector<1x64x32xf32>
    tpu.vector_store %arg8[%c0_13, %c15, %c128], %4 {strides = array<i32>} : memref<1x96x256xf32, #tpu.memory_space<vmem>>, vector<1x64x32xf32>,
    %c0_14 = arith.constant 0 : index
    %c14 = arith.constant 14 : index
    %c160 = arith.constant 160 : index
    %12 = vector.load %arg8[%c0_14, %c14, %c160] : memref<1x96x256xf32, #tpu.memory_space<vmem>>, vector<1x64x32xf32>
    tpu.vector_store %arg8[%c0_14, %c14, %c160], %4 {strides = array<i32>} : memref<1x96x256xf32, #tpu.memory_space<vmem>>, vector<1x64x32xf32>,
    %c0_15 = arith.constant 0 : index
    %c13 = arith.constant 13 : index
    %c192 = arith.constant 192 : index
    %13 = vector.load %arg8[%c0_15, %c13, %c192] : memref<1x96x256xf32, #tpu.memory_space<vmem>>, vector<1x64x32xf32>
    tpu.vector_store %arg8[%c0_15, %c13, %c192], %4 {strides = array<i32>} : memref<1x96x256xf32, #tpu.memory_space<vmem>>, vector<1x64x32xf32>,
    %c0_16 = arith.constant 0 : index
    %c12 = arith.constant 12 : index
    %c224 = arith.constant 224 : index
    %14 = vector.load %arg8[%c0_16, %c12, %c224] : memref<1x96x256xf32, #tpu.memory_space<vmem>>, vector<1x64x32xf32>
    tpu.vector_store %arg8[%c0_16, %c12, %c224], %4 {strides = array<i32>} : memref<1x96x256xf32, #tpu.memory_space<vmem>>, vector<1x64x32xf32>,
    %cst_17 = arith.constant 0xFF800000 : f32
    %15 = vector.broadcast %cst_17 : f32 to vector<1x1x4xf32>
    %c0_18 = arith.constant 0 : index
    %c0_19 = arith.constant 0 : index
    %c0_20 = arith.constant 0 : index
    %16 = vector.load %arg9[%c0_18, %c0_19, %c0_20] : memref<1x66x4xf32, #tpu.memory_space<vmem>>, vector<1x1x4xf32>
    tpu.vector_store %arg9[%c0_18, %c0_19, %c0_20], %15 {strides = array<i32>} : memref<1x66x4xf32, #tpu.memory_space<vmem>>, vector<1x1x4xf32>,
    %cst_21 = arith.constant 0xFF800000 : f32
    %17 = vector.broadcast %cst_21 : f32 to vector<1x1x4xf32>
    %c0_22 = arith.constant 0 : index
    %c65 = arith.constant 65 : index
    %c0_23 = arith.constant 0 : index
    %18 = vector.load %arg9[%c0_22, %c65, %c0_23] : memref<1x66x4xf32, #tpu.memory_space<vmem>>, vector<1x1x4xf32>
    tpu.vector_store %arg9[%c0_22, %c65, %c0_23], %17 {strides = array<i32>} : memref<1x66x4xf32, #tpu.memory_space<vmem>>, vector<1x1x4xf32>,
    %19 = arith.extf %0 : vector<1x64x4xbf16> to vector<1x64x4xf32>
    %c0_24 = arith.constant 0 : index
    %c1 = arith.constant 1 : index
    %c0_25 = arith.constant 0 : index
    %20 = vector.load %arg9[%c0_24, %c1, %c0_25] : memref<1x66x4xf32, #tpu.memory_space<vmem>>, vector<1x64x4xf32>
    tpu.vector_store %arg9[%c0_24, %c1, %c0_25], %19 {strides = array<i32>} : memref<1x66x4xf32, #tpu.memory_space<vmem>>, vector<1x64x4xf32>,
    %c0_26 = arith.constant 0 : index
    %c0_27 = arith.constant 0 : index
    %c0_28 = arith.constant 0 : index
    %21 = vector.load %arg9[%c0_26, %c0_27, %c0_28] : memref<1x66x4xf32, #tpu.memory_space<vmem>>, vector<1x64x4xf32>
    %c0_29 = arith.constant 0 : index
    %c1_30 = arith.constant 1 : index
    %c0_31 = arith.constant 0 : index
    %22 = vector.load %arg9[%c0_29, %c1_30, %c0_31] : memref<1x66x4xf32, #tpu.memory_space<vmem>>, vector<1x64x4xf32>
    %23 = arith.maximumf %21, %22 : vector<1x64x4xf32>
    %c0_32 = arith.constant 0 : index
    %c2 = arith.constant 2 : index
    %c0_33 = arith.constant 0 : index
    %24 = vector.load %arg9[%c0_32, %c2, %c0_33] : memref<1x66x4xf32, #tpu.memory_space<vmem>>, vector<1x64x4xf32>
    %25 = arith.maximumf %23, %24 : vector<1x64x4xf32>
    %26 = vector.shape_cast %25 : vector<1x64x4xf32> to vector<64x4xf32>
    %27 = arith.truncf %26 : vector<64x4xf32> to vector<64x4xbf16>
    %c0_34 = arith.constant 0 : index
    %c0_35 = arith.constant 0 : index
    %28 = vector.load %arg4[%c0_34, %c0_35] : memref<4x128xbf16, #tpu.memory_space<vmem>>, vector<4x128xbf16>
    %cst_36 = arith.constant dense<0.000000e+00> : vector<64x128xf32>
    %29 = tpu.matmul %27, %28, %cst_36 {dimension_numbers = #tpu.dot_dimension_numbers<[1], [0], [0], [1], [0, 0, 1, 1], [], []>} : vector<64x4xbf16>, vector<4x128xbf16>, vector<64x128xf32> -> vector<64x128xf32>
    %c0_37 = arith.constant 0 : index
    %c0_38 = arith.constant 0 : index
    %30 = vector.load %arg10[%c0_37, %c0_38] : memref<64x128xf32, #tpu.memory_space<vmem>>, vector<64x128xf32>
    tpu.vector_store %arg10[%c0_37, %c0_38], %29 {strides = array<i32>} : memref<64x128xf32, #tpu.memory_space<vmem>>, vector<64x128xf32>,
    %c0_39 = arith.constant 0 : index
    %c0_40 = arith.constant 0 : index
    %c0_41 = arith.constant 0 : index
    %31 = vector.load %arg8[%c0_39, %c0_40, %c0_41] : memref<1x96x256xf32, #tpu.memory_space<vmem>>, vector<1x64x256xf32>
    %32 = vector.shape_cast %31 : vector<1x64x256xf32> to vector<64x256xf32>
    %c0_42 = arith.constant 0 : index
    %c0_43 = arith.constant 0 : index
    %33 = vector.load %arg10[%c0_42, %c0_43] : memref<64x128xf32, #tpu.memory_space<vmem>>, vector<64x128xf32>
    %34 = arith.truncf %32 : vector<64x256xf32> to vector<64x256xbf16>
    %c0_44 = arith.constant 0 : index
    %c0_45 = arith.constant 0 : index
    %c0_46 = arith.constant 0 : index
    %35 = vector.load %arg3[%c0_44, %c0_45, %c0_46] : memref<5x256x128xbf16, #tpu.memory_space<vmem>>, vector<1x256x128xbf16>
    %36 = vector.shape_cast %35 : vector<1x256x128xbf16> to vector<256x128xbf16>
    %cst_47 = arith.constant dense<0.000000e+00> : vector<64x128xf32>
    %37 = tpu.matmul %34, %36, %cst_47 {dimension_numbers = #tpu.dot_dimension_numbers<[1], [0], [0], [1], [0, 0, 1, 1], [], []>} : vector<64x256xbf16>, vector<256x128xbf16>, vector<64x128xf32> -> vector<64x128xf32>
    %38 = arith.addf %33, %37 : vector<64x128xf32>
    %c0_48 = arith.constant 0 : index
    %c0_49 = arith.constant 0 : index
    %39 = vector.load %arg10[%c0_48, %c0_49] : memref<64x128xf32, #tpu.memory_space<vmem>>, vector<64x128xf32>
    tpu.vector_store %arg10[%c0_48, %c0_49], %38 {strides = array<i32>} : memref<64x128xf32, #tpu.memory_space<vmem>>, vector<64x128xf32>,
    %c0_50 = arith.constant 0 : index
    %c8 = arith.constant 8 : index
    %c0_51 = arith.constant 0 : index
    %40 = vector.load %arg8[%c0_50, %c8, %c0_51] : memref<1x96x256xf32, #tpu.memory_space<vmem>>, vector<1x64x256xf32>
    %41 = vector.shape_cast %40 : vector<1x64x256xf32> to vector<64x256xf32>
    %c0_52 = arith.constant 0 : index
    %c0_53 = arith.constant 0 : index
    %42 = vector.load %arg10[%c0_52, %c0_53] : memref<64x128xf32, #tpu.memory_space<vmem>>, vector<64x128xf32>
    %43 = arith.truncf %41 : vector<64x256xf32> to vector<64x256xbf16>
    %c1_54 = arith.constant 1 : index
    %c0_55 = arith.constant 0 : index
    %c0_56 = arith.constant 0 : index
    %44 = vector.load %arg3[%c1_54, %c0_55, %c0_56] : memref<5x256x128xbf16, #tpu.memory_space<vmem>>, vector<1x256x128xbf16>
    %45 = vector.shape_cast %44 : vector<1x256x128xbf16> to vector<256x128xbf16>
    %cst_57 = arith.constant dense<0.000000e+00> : vector<64x128xf32>
    %46 = tpu.matmul %43, %45, %cst_57 {dimension_numbers = #tpu.dot_dimension_numbers<[1], [0], [0], [1], [0, 0, 1, 1], [], []>} : vector<64x256xbf16>, vector<256x128xbf16>, vector<64x128xf32> -> vector<64x128xf32>
    %47 = arith.addf %42, %46 : vector<64x128xf32>
    %c0_58 = arith.constant 0 : index
    %c0_59 = arith.constant 0 : index
    %48 = vector.load %arg10[%c0_58, %c0_59] : memref<64x128xf32, #tpu.memory_space<vmem>>, vector<64x128xf32>
    tpu.vector_store %arg10[%c0_58, %c0_59], %47 {strides = array<i32>} : memref<64x128xf32, #tpu.memory_space<vmem>>, vector<64x128xf32>,
    %c0_60 = arith.constant 0 : index
    %c16_61 = arith.constant 16 : index
    %c0_62 = arith.constant 0 : index
    %49 = vector.load %arg8[%c0_60, %c16_61, %c0_62] : memref<1x96x256xf32, #tpu.memory_space<vmem>>, vector<1x64x256xf32>
    %50 = vector.shape_cast %49 : vector<1x64x256xf32> to vector<64x256xf32>
    %c0_63 = arith.constant 0 : index
    %c0_64 = arith.constant 0 : index
    %51 = vector.load %arg10[%c0_63, %c0_64] : memref<64x128xf32, #tpu.memory_space<vmem>>, vector<64x128xf32>
    %52 = arith.truncf %50 : vector<64x256xf32> to vector<64x256xbf16>
    %c2_65 = arith.constant 2 : index
    %c0_66 = arith.constant 0 : index
    %c0_67 = arith.constant 0 : index
    %53 = vector.load %arg3[%c2_65, %c0_66, %c0_67] : memref<5x256x128xbf16, #tpu.memory_space<vmem>>, vector<1x256x128xbf16>
    %54 = vector.shape_cast %53 : vector<1x256x128xbf16> to vector<256x128xbf16>
    %cst_68 = arith.constant dense<0.000000e+00> : vector<64x128xf32>
    %55 = tpu.matmul %52, %54, %cst_68 {dimension_numbers = #tpu.dot_dimension_numbers<[1], [0], [0], [1], [0, 0, 1, 1], [], []>} : vector<64x256xbf16>, vector<256x128xbf16>, vector<64x128xf32> -> vector<64x128xf32>
    %56 = arith.addf %51, %55 : vector<64x128xf32>
    %c0_69 = arith.constant 0 : index
    %c0_70 = arith.constant 0 : index
    %57 = vector.load %arg10[%c0_69, %c0_70] : memref<64x128xf32, #tpu.memory_space<vmem>>, vector<64x128xf32>
    tpu.vector_store %arg10[%c0_69, %c0_70], %56 {strides = array<i32>} : memref<64x128xf32, #tpu.memory_space<vmem>>, vector<64x128xf32>,
    %c0_71 = arith.constant 0 : index
    %c24 = arith.constant 24 : index
    %c0_72 = arith.constant 0 : index
    %58 = vector.load %arg8[%c0_71, %c24, %c0_72] : memref<1x96x256xf32, #tpu.memory_space<vmem>>, vector<1x64x256xf32>
    %59 = vector.shape_cast %58 : vector<1x64x256xf32> to vector<64x256xf32>
    %c0_73 = arith.constant 0 : index
    %c0_74 = arith.constant 0 : index
    %60 = vector.load %arg10[%c0_73, %c0_74] : memref<64x128xf32, #tpu.memory_space<vmem>>, vector<64x128xf32>
    %61 = arith.truncf %59 : vector<64x256xf32> to vector<64x256xbf16>
    %c3 = arith.constant 3 : index
    %c0_75 = arith.constant 0 : index
    %c0_76 = arith.constant 0 : index
    %62 = vector.load %arg3[%c3, %c0_75, %c0_76] : memref<5x256x128xbf16, #tpu.memory_space<vmem>>, vector<1x256x128xbf16>
    %63 = vector.shape_cast %62 : vector<1x256x128xbf16> to vector<256x128xbf16>
    %cst_77 = arith.constant dense<0.000000e+00> : vector<64x128xf32>
    %64 = tpu.matmul %61, %63, %cst_77 {dimension_numbers = #tpu.dot_dimension_numbers<[1], [0], [0], [1], [0, 0, 1, 1], [], []>} : vector<64x256xbf16>, vector<256x128xbf16>, vector<64x128xf32> -> vector<64x128xf32>
    %65 = arith.addf %60, %64 : vector<64x128xf32>
    %c0_78 = arith.constant 0 : index
    %c0_79 = arith.constant 0 : index
    %66 = vector.load %arg10[%c0_78, %c0_79] : memref<64x128xf32, #tpu.memory_space<vmem>>, vector<64x128xf32>
    tpu.vector_store %arg10[%c0_78, %c0_79], %65 {strides = array<i32>} : memref<64x128xf32, #tpu.memory_space<vmem>>, vector<64x128xf32>,
    %c0_80 = arith.constant 0 : index
    %c32_81 = arith.constant 32 : index
    %c0_82 = arith.constant 0 : index
    %67 = vector.load %arg8[%c0_80, %c32_81, %c0_82] : memref<1x96x256xf32, #tpu.memory_space<vmem>>, vector<1x64x256xf32>
    %68 = vector.shape_cast %67 : vector<1x64x256xf32> to vector<64x256xf32>
    %c0_83 = arith.constant 0 : index
    %c0_84 = arith.constant 0 : index
    %69 = vector.load %arg10[%c0_83, %c0_84] : memref<64x128xf32, #tpu.memory_space<vmem>>, vector<64x128xf32>
    %70 = arith.truncf %68 : vector<64x256xf32> to vector<64x256xbf16>
    %c4 = arith.constant 4 : index
    %c0_85 = arith.constant 0 : index
    %c0_86 = arith.constant 0 : index
    %71 = vector.load %arg3[%c4, %c0_85, %c0_86] : memref<5x256x128xbf16, #tpu.memory_space<vmem>>, vector<1x256x128xbf16>
    %72 = vector.shape_cast %71 : vector<1x256x128xbf16> to vector<256x128xbf16>
    %cst_87 = arith.constant dense<0.000000e+00> : vector<64x128xf32>
    %73 = tpu.matmul %70, %72, %cst_87 {dimension_numbers = #tpu.dot_dimension_numbers<[1], [0], [0], [1], [0, 0, 1, 1], [], []>} : vector<64x256xbf16>, vector<256x128xbf16>, vector<64x128xf32> -> vector<64x128xf32>
    %74 = arith.addf %69, %73 : vector<64x128xf32>
    %c0_88 = arith.constant 0 : index
    %c0_89 = arith.constant 0 : index
    %75 = vector.load %arg10[%c0_88, %c0_89] : memref<64x128xf32, #tpu.memory_space<vmem>>, vector<64x128xf32>
    tpu.vector_store %arg10[%c0_88, %c0_89], %74 {strides = array<i32>} : memref<64x128xf32, #tpu.memory_space<vmem>>, vector<64x128xf32>,
    %c0_90 = arith.constant 0 : index
    %c0_91 = arith.constant 0 : index
    %76 = vector.load %arg10[%c0_90, %c0_91] : memref<64x128xf32, #tpu.memory_space<vmem>>, vector<64x128xf32>
    %c0_92 = arith.constant 0 : index
    %c0_93 = arith.constant 0 : index
    %77 = vector.load %arg5[%c0_92, %c0_93] : memref<64x128xf32, #tpu.memory_space<vmem>>, vector<64x128xf32>
    tpu.vector_store %arg5[%c0_92, %c0_93], %76 {strides = array<i32>} : memref<64x128xf32, #tpu.memory_space<vmem>>, vector<64x128xf32>,
    %78 = vector.shape_cast %76 : vector<64x128xf32> to vector<8x8x128xf32>
    %cst_94 = arith.constant dense<0.000000e+00> : vector<8x128xf32>
    %79 = vector.multi_reduction <add>, %78, %cst_94 [0] : vector<8x8x128xf32> to vector<8x128xf32>
    %80 = vector.shape_cast %79 : vector<8x128xf32> to vector<1x8x128xf32>
    %c0_95 = arith.constant 0 : index
    %c0_96 = arith.constant 0 : index
    %c0_97 = arith.constant 0 : index
    %81 = vector.load %arg6[%c0_95, %c0_96, %c0_97] : memref<1x8x128xf32, #tpu.memory_space<vmem>>, vector<1x8x128xf32>
    tpu.vector_store %arg6[%c0_95, %c0_96, %c0_97], %80 {strides = array<i32>} : memref<1x8x128xf32, #tpu.memory_space<vmem>>, vector<1x8x128xf32>,
    %82 = arith.mulf %78, %78 : vector<8x8x128xf32>
    %cst_98 = arith.constant dense<0.000000e+00> : vector<8x128xf32>
    %83 = vector.multi_reduction <add>, %82, %cst_98 [0] : vector<8x8x128xf32> to vector<8x128xf32>
    %84 = vector.shape_cast %83 : vector<8x128xf32> to vector<1x8x128xf32>
    %c0_99 = arith.constant 0 : index
    %c0_100 = arith.constant 0 : index
    %c0_101 = arith.constant 0 : index
    %85 = vector.load %arg7[%c0_99, %c0_100, %c0_101] : memref<1x8x128xf32, #tpu.memory_space<vmem>>, vector<1x8x128xf32>
    tpu.vector_store %arg7[%c0_99, %c0_100, %c0_101], %84 {strides = array<i32>} : memref<1x8x128xf32, #tpu.memory_space<vmem>>, vector<1x8x128xf32>,
    return
  }
  func.func @transform_0(%arg0: i32) -> (i32, i32, i32) {
    %c0_i32 = arith.constant 0 : i32
    %c0_i32_0 = arith.constant 0 : i32
    %c0_i32_1 = arith.constant 0 : i32
    return %arg0, %c0_i32, %c0_i32_0 : i32, i32, i32
  }
  func.func @transform_1(%arg0: i32) -> (i32, i32) {
    %c0_i32 = arith.constant 0 : i32
    %c0_i32_0 = arith.constant 0 : i32
    %c0_i32_1 = arith.constant 0 : i32
    return %c0_i32, %c0_i32_0 : i32, i32
  }
  func.func @transform_2(%arg0: i32) -> (i32, i32, i32) {
    %c0_i32 = arith.constant 0 : i32
    %c0_i32_0 = arith.constant 0 : i32
    %c0_i32_1 = arith.constant 0 : i32
    %c0_i32_2 = arith.constant 0 : i32
    return %c0_i32, %c0_i32_0, %c0_i32_1 : i32, i32, i32
  }
  func.func @transform_3(%arg0: i32) -> (i32, i32) {
    %c0_i32 = arith.constant 0 : i32
    %c0_i32_0 = arith.constant 0 : i32
    %c0_i32_1 = arith.constant 0 : i32
    return %c0_i32, %c0_i32_0 : i32, i32
  }
  func.func @transform_4(%arg0: i32) -> (i32, i32) {
    %c0_i32 = arith.constant 0 : i32
    %c0_i32_0 = arith.constant 0 : i32
    return %arg0, %c0_i32 : i32, i32
  }
  func.func @transform_5(%arg0: i32) -> (i32, i32, i32) {
    %c0_i32 = arith.constant 0 : i32
    %c0_i32_0 = arith.constant 0 : i32
    %c0_i32_1 = arith.constant 0 : i32
    return %arg0, %c0_i32, %c0_i32_0 : i32, i32, i32
  }
  func.func @transform_6(%arg0: i32) -> (i32, i32, i32) {
    %c0_i32 = arith.constant 0 : i32
    %c0_i32_0 = arith.constant 0 : i32
    %c0_i32_1 = arith.constant 0 : i32
    return %arg0, %c0_i32, %c0_i32_0 : i32, i32, i32
  }
}

</mosaic_0001>

<bundles_post_ra>
// kernel: tpu_custom_call.1
= control target key start
LH: loop header
LB: loop body
LE: loop exit
PB: predicated region body
PF: predicated region fallthrough
CT: control target
= control target key end

     0   :  { %s4157_s0 = inlined_call_operand.hbm [shape: bf16[2,64,4], index: 0, kind: input, shape index: {}]   ;;  %s4158_s1 = inlined_call_operand.hbm [shape: bf16[4,32], index: 1, kind: input, shape index: {}]   ;;  %s4159_s2 = inlined_call_operand.hbm [shape: bf16[5,256,128], index: 2, kind: input, shape index: {}]   ;;  %s4160_s3 = inlined_call_operand.hbm [shape: bf16[4,128], index: 3, kind: input, shape index: {}]   ;;  %s4161_s4 = inlined_call_operand.hbm [shape: f32[128,128], index: 4, kind: output, shape index: {0}]   ;;  %s4162_s5 = inlined_call_operand.hbm [shape: f32[2,8,128], index: 5, kind: output, shape index: {1}]   ;;  %s4163_s6 = inlined_call_operand.hbm [shape: f32[2,8,128], index: 6, kind: output, shape index: {2}]  }
   0x1   :  { %4174 = sst [smem:[#allocation22_spill]] %s4157_s0 }
   0x2   :  { %4175 = sst [smem:[#allocation23_spill]] %s4158_s1 }
   0x3   :  { %4176 = sst [smem:[#allocation24_spill]] %s4159_s2 }
   0x4   :  { %12 = vsyncpa [#allocation6], 0 }
   0x5   :  { %14 = vsyncpa [#allocation6 + $0x1], 0 }
   0x6   :  { %15 = vsyncpa [#allocation9], 0 }
   0x7   :  { %16 = vsyncpa [#allocation12], 0 }
   0x8   :  { %17 = vsyncpa [#allocation7], 0 }
   0x9   :  { %19 = vsyncpa [#allocation7 + $0x1], 0 }
   0xa   :  { %20 = vsyncpa [#allocation15], 0 }
   0xb   :  { %22 = vsyncpa [#allocation15 + $0x1], 0  ;;  %s3319_s21 = smov 0   ;;  %s3321_s22 = smov 0  }
   0xc   :  { %s3323_s23 = smov 0   ;;  %s3325_s24 = smov 0  }
   0xd LB: > { %s3340_s25 = sadd.s32 4294967295, %s3265_s24   ;;  %s4167_s26 = sadd.s32 4294967294, %s3265_s24   ;;  %s3265_s24 = sphi %s3325_s24, %s4208_s24   ;;  %s3261_s23 = sphi %s3323_s23, %s4207_s23   ;;  %s3257_s22 = sphi %s3321_s22, %s4206_s22   ;;  %s3253_s21 = sphi %s3319_s21, %s4205_s21  }
   0xe   : > { %p48_p0 = scmp.ne.s32.totalorder %s3257_s22, %s3253_s21  ;;  %p4164_p1 = scmp.eq.s32.totalorder %s3340_s25, 0 }
   0xf   : > { %p141_p3 = scmp.eq.s32.totalorder %s4167_s26, 1  ;;  %p2465_p5 = scmp.ge.s32.totalorder %s3265_s24, 1 }
  0x10   : > { %p3351_p4 = por %p4164_p1, %p48_p0  ;;  %p200_p7 = scmp.lt.s32.totalorder %s3265_s24, 3 }
  0x11   : > { %p3356_p6 = por %p141_p3, %p48_p0  ;;  %s3267_s30 = smov [#allocation8]  }
  0x12   : > { %s4177_s27 = scalar_select %p3351_p4, 1, 0 }
  0x13   : > { %s4178_s28 = scalar_select %p3356_p6, 1, 0 }
  0x14   : > { %p3361_p8 = pnand %p2465_p5, %p200_p7  ;;  %s213_s7 = sshll.u32 %s3267_s30, 4  ;;  %s214_s7 = int_to_ptr.vmem [resolvable:$true] %s213_s7 }
  0x15   : > { %s3268_s8 = smov [#allocation10]   ;;  %s3269_s11 = smov [#allocation11]  }
  0x16   : > { %s4179_s29 = scalar_select %p3361_p8, 1, 0 }
  0x17   : > { %p2852_p10 = pneg %p3361_p8  ;;  %s223_s9 = sshll.u32 %s3268_s8, 4  ;;  %s3374_s9 = int_to_ptr.vmem [resolvable:$true] %s223_s9 }
  0x18   : > { %s3376_s12 = sshll.u32 %s3269_s11, 4  ;;  %s4181_s1 = sld [smem:[#allocation23_spill]]  ;;  %s238_s12 = int_to_ptr.vmem [resolvable:$true] %s3376_s12 }
  0x19   : > { %p3370_p11 = pnand %p2852_p10, %p4164_p1 }
  0x1b   : > { %p3386_p13 = pneg %p3370_p11 }
  0x1e   : > { %s3017_s15 = scalar_lea.hbm %s4181_s1, 32 }
  0x1f   : > { %p3018_p12 = scmp.ne.s32.totalorder %s4181_s1, %s3017_s15  ;;  %p3024_p5 = scmp.lt.u32.totalorder %s3017_s15, %s4181_s1 }
  0x21   : > { %p3020_p0 = pnand %p3386_p13, %p3018_p12 }
  0x23   : > { %p3021_p3 = pneg %p3020_p0 }
  0x25   : > { %p3026_p7 = pnand %p3024_p5, %p3021_p3 }
  0x27   : > { %3029 = shalt.err (!%p3026_p7)
}
  0x28   : > { %s3030_s30 = scalar_lea.vmem %s214_s7, 32  ;;  %p3038_p2 = scmp.lt.s32.totalorder %s214_s7, %s214_s7 }
  0x29   : > { %p3031_p10 = scmp.ne.s32.totalorder %s214_s7, %s3030_s30  ;;  %p3039_p6 = scmp.lt.s32.totalorder %s3030_s30, %s3030_s30 }
  0x2b   : > { %p3033_p9 = pnand %p3031_p10, %p3386_p13  ;;  %p3040_p4 = por %p3039_p6, %p3038_p2 }
  0x2d   : > { %p3034_p1 = pneg %p3033_p9 }
  0x2f   : > { %p3041_p8 = pnand %p3040_p4, %p3034_p1 }
  0x31   : > { %3044 = shalt.err (!%p3041_p8)
}
  0x32   : > { %2855 = dma.hbm_to_vmem [thread:$0]  (!%p3370_p11), %s4181_s1, 32, %s214_s7, [#allocation9]  }
  0x33   : > { %s4183_s2 = sld [smem:[#allocation24_spill]] }
  0x39   : > { %s3045_s15 = scalar_lea.hbm %s4183_s2, 10240 }
  0x3a   : > { %p3046_p9 = scmp.ne.s32.totalorder %s4183_s2, %s3045_s15  ;;  %p3052_p1 = scmp.lt.u32.totalorder %s3045_s15, %s4183_s2 }
  0x3c   : > { %p3048_p12 = pnand %p3046_p9, %p3386_p13 }
  0x3e   : > { %p3049_p2 = pneg %p3048_p12 }
  0x40   : > { %p3054_p4 = pnand %p3052_p1, %p3049_p2 }
  0x42   : > { %3057 = shalt.err (!%p3054_p4)
}
  0x43   : > { %s3058_s7 = scalar_lea.vmem %s3374_s9, 10240  ;;  %p3066_p3 = scmp.lt.s32.totalorder %s3374_s9, %s3374_s9 }
  0x44   : > { %p3059_p6 = scmp.ne.s32.totalorder %s3374_s9, %s3058_s7  ;;  %p3067_p5 = scmp.lt.s32.totalorder %s3058_s7, %s3058_s7 }
  0x46   : > { %p3061_p8 = pnand %p3059_p6, %p3386_p13  ;;  %p3068_p7 = por %p3067_p5, %p3066_p3 }
  0x48   : > { %p3062_p0 = pneg %p3061_p8 }
  0x4a   : > { %p3069_p10 = pnand %p3068_p7, %p3062_p0 }
  0x4c   : > { %3072 = shalt.err (!%p3069_p10)
}
  0x4d   : > { %s3270_s30 = smov 64   ;;  %s3271_s8 = smov 4  }
  0x4e   : > { %2858 = dma.hbm_to_vmem [thread:$0]  (!%p3370_p11), %s4183_s2, 10240, %s3374_s9, [#allocation9], %s3270_s30, %s3270_s30, %s3271_s8  }
  0x4f   : > { %s3073_s16 = scalar_lea.hbm %s4160_s3, 32 }
  0x50   : > { %p3074_p9 = scmp.ne.s32.totalorder %s4160_s3, %s3073_s16  ;;  %p3080_p1 = scmp.lt.u32.totalorder %s3073_s16, %s4160_s3 }
  0x52   : > { %p3076_p12 = pnand %p3074_p9, %p3386_p13 }
  0x54   : > { %p3077_p2 = pneg %p3076_p12 }
  0x56   : > { %p3082_p4 = pnand %p3080_p1, %p3077_p2 }
  0x58   : > { %3085 = shalt.err (!%p3082_p4)
}
  0x59   : > { %s3086_s11 = scalar_lea.vmem %s238_s12, 32  ;;  %p3094_p3 = scmp.lt.s32.totalorder %s238_s12, %s238_s12 }
  0x5a   : > { %p3087_p6 = scmp.ne.s32.totalorder %s238_s12, %s3086_s11  ;;  %p3095_p5 = scmp.lt.s32.totalorder %s3086_s11, %s3086_s11 }
  0x5c   : > { %p3089_p8 = pnand %p3087_p6, %p3386_p13  ;;  %p3096_p7 = por %p3095_p5, %p3094_p3 }
  0x5e   : > { %p3090_p0 = pneg %p3089_p8 }
  0x60   : > { %p3097_p10 = pnand %p3096_p7, %p3090_p0 }
  0x62   : > { %3100 = shalt.err (!%p3097_p10)
}
  0x63   : > { %2861 = dma.hbm_to_vmem [thread:$0]  (!%p3370_p11), %s4160_s3, 32, %s238_s12, [#allocation12]  }
  0x64   : > { %s3448_s18 = sadd.s32 1, %s3265_s24   ;;  %s35_s10 = sadd.s32 1, %s3261_s23 }
  0x65   : > { %s32_s14 = ssub.s32 %s3265_s24, %s3448_s18  ;;  %p42_p9 = scmp.ne.s32.totalorder %s3261_s23, %s3257_s22 }
  0x66   : > { %p33_p13 = scmp.eq.s32.totalorder %s32_s14, 0  ;;  %p43_p12 = scmp.eq.s32.totalorder %s3265_s24, 0 }
  0x67   : > { %p2879_p2 = scmp.lt.s32.totalorder %s3265_s24, 2  ;;  %p4184_p4 = scmp.eq.s32.totalorder %s3340_s25, 1 }
  0x68   : > { %s3458_s15 = scalar_select %p33_p13, %s3261_s23, %s35_s10  }
  0x69   : > { %p44_p1 = por %p43_p12, %p42_p9  ;;  %p3462_p6 = por %p4184_p4, %p42_p9 }
  0x6a   : > { %s248_s17 = sand.u32 1, %s3261_s23   ;;  %s2582_s19 = sshll.u32 %s3265_s24, 9 }
  0x6b   : > { %s2470_s12 = sshll.u32 %s248_s17, 5  ;;  %s4186_s0 = sld [smem:[#allocation22_spill]] }
  0x6c   : > { %s252_s9 = scalar_lea.vmem [#allocation5], %s2470_s12  ;;  %p3473_p11 = pnand %p2879_p2, %p44_p1 }
  0x6d   : > { %s259_s13 = sshll.u32 %s252_s9, 4  ;;  %s3479_s10 = scalar_lea.sflag [#allocation6], %s248_s17  ;;  %s3477_s13 = int_to_ptr.vmem [resolvable:$true] %s259_s13 }
  0x6e   : > { %p3103_p0 = pneg %p3473_p11 }
  0x71   : > { %s3471_s11 = scalar_lea.hbm %s4186_s0, %s2582_s19  ;;  %s3106_s20 = scalar_lea.hbm %s4186_s0, 1024 }
  0x72   : > { %s3101_s26 = scalar_lea.hbm %s3471_s11, 512  ;;  %p3107_p7 = scmp.lt.u32.totalorder %s3471_s11, %s4186_s0 }
  0x73   : > { %p3102_p8 = scmp.ne.s32.totalorder %s3471_s11, %s3101_s26  ;;  %p3108_p10 = scmp.lt.u32.totalorder %s3106_s20, %s3101_s26 }
  0x74   : > { %p3110_p9 = scmp.lt.u32.totalorder %s3101_s26, %s3471_s11 }
  0x75   : > { %p3104_p3 = pnand %p3103_p0, %p3102_p8  ;;  %p3109_p13 = por %p3108_p10, %p3107_p7 }
  0x77   : > { %p3105_p5 = pneg %p3104_p3  ;;  %p3111_p12 = por %p3110_p9, %p3109_p13 }
  0x79   : > { %p3112_p2 = pnand %p3111_p12, %p3105_p5 }
  0x7b   : > { %3115 = shalt.err (!%p3112_p2)
}
  0x7c   : > { %s3116_s17 = scalar_lea.vmem %s3477_s13, 512  ;;  %s3272_s19 = smov [#allocation5]  }
  0x7d   : > { %p3117_p1 = scmp.ne.s32.totalorder %s3477_s13, %s3116_s17  ;;  %s3121_s12 = sshll.u32 %s3272_s19, 4  ;;  %s3122_s12 = int_to_ptr.vmem [resolvable:$false] %s3121_s12 }
  0x7e   : > { %s3123_s7 = scalar_lea.vmem %s3122_s12, 1024  ;;  %p3124_p3 = scmp.lt.s32.totalorder %s3477_s13, %s3122_s12 }
  0x7f   : > { %p3119_p4 = pnand %p3117_p1, %p3103_p0  ;;  %p3125_p7 = scmp.lt.s32.totalorder %s3123_s7, %s3116_s17 }
  0x81   : > { %p3120_p8 = pneg %p3119_p4  ;;  %p3126_p10 = por %p3125_p7, %p3124_p3 }
  0x83   : > { %p3127_p13 = pnand %p3126_p10, %p3120_p8 }
  0x85   : > { %3130 = shalt.err (!%p3127_p13)
}
  0x86   : > { %2865 = dma.hbm_to_vmem [thread:$0]  (!%p3473_p11), %s3471_s11, 512, %s3477_s13, %s3479_s10, %s3270_s30, %s3270_s30, %s3271_s8  }
  0x87   : > { %p4188_p0 = scmp.ne.s32.totalorder %s4179_s29, 0 }
  0x88   : > { %s3513_s26 = sand.u32 (!%p4188_p0), 1, %s3257_s22   ;;  %p4189_p5 = scmp.ne.s32.totalorder (!%p4188_p0), %s4177_s27, 0 }
  0x89   : > { %271 = sbr.rel (%p4188_p0) target bundleno = 919 (0x397), region = 36  ;;  %s2474_s20 = sshll.u32 (!%p4188_p0), %s3513_s26, 5 }
  0x8a   : > { %s274_s9 = scalar_lea.sflag (!%p4188_p0), [#allocation6], %s3513_s26  ;;  %s277_s17 = scalar_lea.vmem (!%p4188_p0), [#allocation5], %s2474_s20 }
  0x90   : > { %3232 = dma.done.wait (%p4189_p5), %s274_s9, 512  }
  0x91   : > { %3234 = vsyncadd (%p4189_p5), %s274_s9, 4294966784  ;;  %p4190_p9 = scmp.eq.s32.totalorder %s3340_s25, 0 }
  0x93   : > { %3236 = dma.done.wait (%p4190_p9), [#allocation9], 10272   ;;  %p4191_p11 = pmov %p4190_p9 }
  0x94   : > { %p4192_p12 = pmov %p4190_p9 }
  0x95   : > { %3238 = vsyncadd (%p4191_p11), [#allocation9], 4294957024 }
  0x96   : > { %3240 = dma.done.wait (%p4192_p12), [#allocation12], 32   ;;  %p4193_p2 = pmov %p4190_p9 }
  0x97   : > { %vm372_vm0 = vcmask 1041408   ;;  %v338_v0 = vld [vmem:[#allocation8] sm:$0x3]  ;;  %vm359_vm1 = vcmask 31744   ;;  %v332_v2 = vld [vmem:[%s277_s17 + $0x8] sm:$0xff]   ;;  %v334_v6 = vld [vmem:[%s277_s17 + $0x10] sm:$0xff]  }
  0x98   : > { %3242 = vsyncadd (%p4193_p2), [#allocation12], 4294967264  ;;  %v330_v1 = vld [vmem:[%s277_s17] sm:$0xff]   ;;  %2830 = vmatprep.subr.msk.bf16.mxu0 %vm372_vm0, %v338_v0  ;;  %v374_v3 = vsel %vm372_vm0, %v338_v0, 0  ;;  %v336_v7 = vld [vmem:[%s277_s17 + $0x18] sm:$0xff]   ;;  %v855_v8 = vunpack.c.l.bf16 %v332_v2  ;;  %v856_v9 = vunpack.c.h.bf16 %v332_v2  ;;  %v857_v10 = vunpack.c.l.bf16 %v334_v6  ;;  %s3274_s27 = smov 96  }
  0x99   : > { %v853_v4 = vunpack.c.l.bf16 %v330_v1  ;;  %v854_v5 = vunpack.c.h.bf16 %v330_v1  ;;  %2795 = vmatpush3.bf16.msra.mxu0 %v374_v3  ;;  %2796 = vmatprep.mubr.msk.bf16.mxu0 %vm359_vm1, %v330_v1  ;;  %v858_v11 = vunpack.c.h.bf16 %v334_v6  ;;  %v859_v12 = vunpack.c.l.bf16 %v336_v7  ;;  %v2932_v15 = vld [vmem:[#allocation10 + $0x40] sm:$0xff]   ;;  %v2934_v17 = vld [vmem:[#allocation10 + $0x48] sm:$0xff]   ;;  %v2936_v24 = vld [vmem:[#allocation10 + $0x50] sm:$0xff]   ;;  %s3275_s29 = smov 32   ;;  %s3276_s30 = smov 64  }
  0x9a   : > { %863 = vst.msk [vmem:[#allocation3 + $0x11] sm:$0xff] %vm359_vm1, %v855_v8  ;;  %864 = vst.msk [vmem:[#allocation3 + $0x19] sm:$0xff] %vm359_vm1, %v856_v9  ;;  %v860_v13 = vunpack.c.h.bf16 %v336_v7  ;;  %v4168_v14 = vmov 0.0   ;;  %v2933_v16 = vld [vmem:[#allocation10] sm:$0xff]   ;;  %2594 = vmatprep.subr.bf16.mxu0 %v2932_v15  ;;  %vm688_vm2 = vcmask 1045504   ;;  %vm564_vm3 = vcmask 1040384  }
  0x9b   : > { %861 = vst.msk [vmem:[#allocation3 + $0x1] sm:$0xff] %vm359_vm1, %v853_v4  ;;  %862 = vst.msk [vmem:[#allocation3 + $0x9] sm:$0xff] %vm359_vm1, %v854_v5  ;;  %vm742_vm4 = vcmask 1044480   ;;  %vm796_vm5 = vcmask 1043456   ;;  %vm677_vm6 = vcmask 261127   ;;  %v2935_v19 = vld [vmem:[#allocation10 + $0x8] sm:$0xff]  }
  0x9c   : > { %2797 = vmatmul.mubr.msk.bf16.vlgmr.msra.gmra.mrb[0].mxu0 %vm359_vm1, %v332_v2  ;;  %865 = vst.msk [vmem:[#allocation3 + $0x21] sm:$0xff] %vm359_vm1, %v857_v10  ;;  %866 = vst.msk [vmem:[#allocation3 + $0x29] sm:$0xff] %vm359_vm1, %v858_v11  ;;  %vm498_vm7 = vcmask 261123   ;;  %v3595_v39 = vld [vmem:[#allocation11] sm:$0x3]  ;;  %v2937_v44 = vld [vmem:[#allocation10 + $0x10] sm:$0xff]  }
  0x9d   : > { %867 = vst.msk [vmem:[#allocation3 + $0x31] sm:$0xff] %vm359_vm1, %v859_v12  ;;  %2800 = vmatprep.mubr.msk.bf16.mxu0 %vm359_vm1, %v334_v6  ;;  %868 = vst.msk [vmem:[#allocation3 + $0x39] sm:$0xff] %vm359_vm1, %v860_v13  ;;  %2595 = vmatpush3.bf16.msra.mxu0 %v2933_v16  ;;  %v2938_v53 = vld [vmem:[#allocation10 + $0x58] sm:$0xff]   ;;  %v2942_v16 = vld [vmem:[#allocation10 + $0x60] sm:$0xff]   ;;  %vm473_vm8 = vcmask 1042432   ;;  %vm500_vm9 = vcmask 261120  }
  0x9e   : > { %444 = vst [vmem:[#allocation2 + $0x18] sm:$0xff] %v4168_v14  ;;  %441 = vst [vmem:[#allocation2] sm:$0xff] %v4168_v14  ;;  %2596 = vmatprep.subr.bf16.mxu0 %v2934_v17  ;;  %2831 = vmatprep.subr.msk.bf16.mxu1 %vm372_vm0, %v3595_v39  ;;  %v2940_v5 = vld [vmem:[#allocation10 + $0x18] sm:$0xff]   ;;  %vm850_vm10 = vcmask 24576   ;;  %vm652_vm11 = vcmask 1046528   ;;  %vm686_vm12 = vcmask 260096  }
  0x9f   : > { %445 = vst [vmem:[#allocation2 + $0x20] sm:$0xff] %v4168_v14  ;;  %446 = vst [vmem:[#allocation2 + $0x28] sm:$0xff] %v4168_v14  ;;  %vm508_vm13 = vcmask 256000   ;;  %vm731_vm14 = vcmask 523526   ;;  %vm785_vm15 = vcmask 785925   ;;  %s2478_s8 = sshll.u32 %s3513_s26, 6 }
  0xa0   : > { %447 = vst [vmem:[#allocation2 + $0x30] sm:$0xff] %v4168_v14  ;;  %448 = vst [vmem:[#allocation2 + $0x38] sm:$0xff] %v4168_v14  ;;  %s4015_s11 = scalar_lea.vmem [#allocation13], %s2478_s8  ;;  %s2479_s13 = sshll.u32 %s3513_s26, 3 }
  0xa1   : > { %449 = vst [vmem:[#allocation2 + $0x40] sm:$0xff] %v4168_v14  ;;  %450 = vst [vmem:[#allocation2 + $0x48] sm:$0xff] %v4168_v14  ;;  %2597 = vmatpush3.bf16.msra.mxu0 %v2935_v19  ;;  %s2275_s14 = sshll.u32 %s4015_s11, 4  ;;  %s2583_s10 = sshll.u32 %s3340_s25, 10  ;;  %s4025_s14 = int_to_ptr.vmem [resolvable:$true] %s2275_s14 }
  0xa2   : > { %451 = vst [vmem:[#allocation2 + $0x50] sm:$0xff] %v4168_v14  ;;  %452 = vst [vmem:[#allocation2 + $0x58] sm:$0xff] %v4168_v14  ;;  %2598 = vmatprep.subr.bf16.mxu0 %v2936_v24  ;;  %s4173_s12 = sshll.u32 %s3340_s25, 7  ;;  %s4030_s7 = scalar_lea.vmem [#allocation14], %s2479_s13 }
  0xa3   : > { %453 = vst [vmem:[#allocation2 + $0x60] sm:$0xff] %v4168_v14  ;;  %454 = vst [vmem:[#allocation2 + $0x68] sm:$0xff] %v4168_v14  ;;  %s2291_s20 = sshll.u32 %s4030_s7, 4  ;;  %s3131_s19 = scalar_lea.vmem %s4025_s14, 1024  ;;  %s4050_s20 = int_to_ptr.vmem [resolvable:$true] %s2291_s20 }
  0xa4   : > { %2801 = vmatmul.mubr.msk.bf16.gmra.mrb[4].mxu0 %vm359_vm1, %v336_v7  ;;  %455 = vst [vmem:[#allocation2 + $0x70] sm:$0xff] %v4168_v14  ;;  %456 = vst [vmem:[#allocation2 + $0x78] sm:$0xff] %v4168_v14  ;;  %p3132_p1 = scmp.ne.s32.totalorder %s4025_s14, %s3131_s19 }
  0xa5   : > { %457 = vst [vmem:[#allocation2 + $0x80] sm:$0xff] %v4168_v14  ;;  %458 = vst [vmem:[#allocation2 + $0x88] sm:$0xff] %v4168_v14  ;;  %2599 = vmatpush3.bf16.msra.mxu0 %v2937_v44 }
  0xa6   : > { %459 = vst [vmem:[#allocation2 + $0x90] sm:$0xff] %v4168_v14  ;;  %460 = vst [vmem:[#allocation2 + $0x98] sm:$0xff] %v4168_v14  ;;  %2600 = vmatprep.subr.bf16.mxu0 %v2938_v53  ;;  %p3133_p4 = pnand %p3132_p1, %p3462_p6 }
  0xa7   : > { %461 = vst [vmem:[#allocation2 + $0xa0] sm:$0xff] %v4168_v14 }
  0xa8   : > { %p3134_p8 = pneg %p3133_p4 }
  0xa9   : > { %2601 = vmatpush3.bf16.msra.mxu0 %v2940_v5 }
  0xaa   : > { %2602 = vmatprep.subr.bf16.mxu0 %v2942_v16  ;;  %v2952_v16 = vld [vmem:[#allocation10 + $0x30] sm:$0xff]  }
 0x16f   : > { %v3562_v18 = vpop.f32.mrb[0].mxu0 }
 0x170   : > { %623 = vrot.lane.b32.xlu1 %v3562_v18, %s3274_s27  ;;  %v3566_v20 = vpop.f32.mrb[1].mxu0  ;;  %v513_v21 = vrot.slane %v3562_v18, 6  ;;  %v692_v22 = vrot.slane %v3562_v18, 2  ;;  %v568_v23 = vrot.slane %v3562_v18, 7  ;;  %v746_v29 = vrot.slane %v3562_v18, 3 }
 0x171   : > { %v474_v25 = vrot.slane %v3566_v20, 5  ;;  %v653_v26 = vrot.slane %v3566_v20, 1  ;;  %v3573_v27 = vpop.f32.mrb[2].mxu0  ;;  %v689_v28 = vrot.slane %v3566_v20, 2  ;;  %v797_v31 = vrot.slane %v3566_v20, 4 }
 0x172   : > { %625 = vrot.lane.b32.xlu0 %v3573_v27, %s3274_s27  ;;  %v3579_v30 = vpop.f32.mrb[3].mxu0  ;;  %v743_v32 = vrot.slane %v3566_v20, 3  ;;  %v510_v33 = vrot.slane %v3566_v20, 6  ;;  %v515_v34 = vrot.slane %v3573_v27, 6  ;;  %v694_v35 = vrot.slane %v3573_v27, 2 }
 0x173   : > { %v570_v36 = vrot.slane %v3573_v27, 7  ;;  %v748_v37 = vrot.slane %v3573_v27, 3  ;;  %v690_v38 = vrot.slane %v3579_v30, 2  ;;  %678 = vst.msk [vmem:[#allocation2 + $0x18] sm:$0x80] %vm677_vm6, %v653_v26  ;;  %v800_v41 = vrot.slane %v3562_v18, 4 }
 0x174   : > { %499 = vst.msk [vmem:[#allocation2 + $0x20] sm:$0xf8] %vm498_vm7, %v474_v25  ;;  %619 = vrot.lane.b32.xlu1 %v3566_v20, %s3274_s27  ;;  %v3602_v40 = vsel %vm372_vm0, %v513_v21, %v515_v34  ;;  %v802_v42 = vrot.slane %v3573_v27, 4  ;;  %v511_v43 = vrot.slane %v3579_v30, 6  ;;  %v3610_v45 = vsel %vm688_vm2, %v692_v22, %v694_v35 }
 0x175   : > { %v3615_v46 = vsel %vm564_vm3, %v568_v23, %v570_v36  ;;  %v3618_v47 = vsel %vm742_vm4, %v746_v29, %v748_v37  ;;  %v3621_v48 = vsel %vm688_vm2, %v690_v38, %v692_v22  ;;  %v3631_v51 = vsel %vm688_vm2, %v689_v28, %v690_v38 }
 0x176   : > { %704 = vrot.lane.b32.xlu0 %v689_v28, %s3275_s29  ;;  %v3625_v49 = vsel %vm796_vm5, %v800_v41, %v802_v42  ;;  %v3628_v50 = vsel %vm372_vm0, %v510_v33, %v511_v43  ;;  %v744_v52 = vrot.slane %v3579_v30, 3  ;;  %v565_v55 = vrot.slane %v3566_v20, 7 }
 0x177   : > { %v3634_v54 = vpop.f32.mrb[4].mxu0  ;;  %v566_v56 = vrot.slane %v3579_v30, 7  ;;  %v798_v57 = vrot.slane %v3579_v30, 4  ;;  %v3640_v58 = vsel %vm372_vm0, %v511_v43, %v513_v21  ;;  %v2948_v43 = vld [vmem:[#allocation10 + $0x28] sm:$0xff]   ;;  %v654_v14 = vrot.slane %v3579_v30, 1 }
 0x178   : > { %812 = vrot.lane.b32.xlu1 %v797_v31, %s3274_s27  ;;  %v3643_v59 = vpop.f32.mrb[5].mxu0  ;;  %v3646_v60 = vsel %vm742_vm4, %v744_v52, %v746_v29  ;;  %v3649_v61 = vsel %vm742_vm4, %v743_v32, %v744_v52  ;;  %v700_v62 = vrot.slane %v3634_v54, 2  ;;  %v754_v63 = vrot.slane %v3634_v54, 3 }
 0x179   : > { %v3654_v0 = vsel %vm564_vm3, %v565_v55, %v566_v56  ;;  %v3657_v1 = vsel %vm796_vm5, %v797_v31, %v798_v57  ;;  %v3659_v2 = vpop.f32.mrb[6].mxu0  ;;  %v3662_v3 = vsel %vm796_vm5, %v798_v57, %v800_v41  ;;  %v3665_v4 = vsel %vm564_vm3, %v566_v56, %v568_v23  ;;  %v2944_v23 = vld [vmem:[#allocation10 + $0x20] sm:$0xff]  }
 0x17a   : > { %758 = vrot.lane.b32.xlu0 %v743_v32, %s3276_s30  ;;  %v3668_v6 = vpop.f32.mrb[7].mxu0  ;;  %v696_v7 = vrot.slane %v3643_v59, 2  ;;  %v750_v8 = vrot.slane %v3643_v59, 3  ;;  %v517_v9 = vrot.slane %v3643_v59, 6  ;;  %v804_v10 = vrot.slane %v3643_v59, 4  ;;  %v2946_v32 = vld [vmem:[#allocation10 + $0x68] sm:$0xff]   ;;  %2603 = vmatpush3.bf16.msra.mxu0 %v2944_v23 }
 0x17b   : > { %v572_v11 = vrot.slane %v3643_v59, 7  ;;  %v698_v12 = vrot.slane %v3668_v6, 2  ;;  %v702_v13 = vrot.slane %v3659_v2, 2  ;;  %v519_v15 = vrot.slane %v3668_v6, 6  ;;  %2604 = vmatprep.subr.bf16.mxu0 %v2946_v32  ;;  %v871_v32 = vld [vmem:[#allocation3 + $0x10] sm:$0xff] }
 0x17c   : > { %525 = vrot.lane.b32.xlu1 %v510_v33, %s3275_s29  ;;  %v3680_v17 = vsel %vm688_vm2, %v694_v35, %v696_v7  ;;  %v3683_v19 = vsel %vm742_vm4, %v748_v37, %v750_v8  ;;  %v3688_v21 = vsel %vm372_vm0, %v515_v34, %v517_v9  ;;  %v3691_v22 = vsel %vm796_vm5, %v802_v42, %v804_v10 }
 0x17d   : > { %v3696_v24 = vsel %vm564_vm3, %v570_v36, %v572_v11  ;;  %v3699_v28 = vsel %vm688_vm2, %v698_v12, %v700_v62  ;;  %v3704_v29 = vsel %vm688_vm2, %v700_v62, %v702_v13  ;;  %v3707_v31 = vsel %vm372_vm0, %v517_v9, %v519_v15 }
 0x17e   : > { %621 = vrot.lane.b32.xlu0 %v3579_v30, %s3274_s27  ;;  %v3712_v33 = vsel %vm688_vm2, %v696_v7, %v698_v12  ;;  %v752_v34 = vrot.slane %v3668_v6, 3  ;;  %v574_v35 = vrot.slane %v3668_v6, 7  ;;  %v806_v36 = vrot.slane %v3668_v6, 4  ;;  %v2939_v7 = vld [vmem:[#allocation10 + $0xc0] sm:$0xff]   ;;  %2605 = vmatpush3.bf16.msra.mxu0 %v2948_v43 }
 0x17f   : > { %v808_v37 = vrot.slane %v3634_v54, 4  ;;  %v756_v38 = vrot.slane %v3659_v2, 3  ;;  %v521_v41 = vrot.slane %v3634_v54, 6  ;;  %v4172_v42 = vrot.slane %v3659_v2, 4 }
 0x180   : > { %580 = vrot.lane.b32.xlu1 %v565_v55, %s3276_s30  ;;  %v3723_v44 = vsel %vm742_vm4, %v752_v34, %v754_v63  ;;  %v3726_v52 = vsel %vm742_vm4, %v750_v8, %v752_v34  ;;  %v3729_v53 = vsel %vm564_vm3, %v572_v11, %v574_v35  ;;  %v3732_v56 = vsel %vm796_vm5, %v804_v10, %v806_v36  ;;  %v2950_v8 = vld [vmem:[#allocation10 + $0x70] sm:$0xff]  }
 0x181   : > { %v3735_v57 = vsel %vm796_vm5, %v806_v36, %v808_v37  ;;  %v3740_v62 = vsel %vm742_vm4, %v754_v63, %v756_v38  ;;  %v3743_v55 = vsel %vm372_vm0, %v519_v15, %v521_v41  ;;  %v3748_v5 = vsel %vm796_vm5, %v808_v37, %v4172_v42  ;;  %v872_v34 = vld [vmem:[#allocation3 + $0x18] sm:$0xff]  ;;  %2606 = vmatprep.subr.bf16.mxu0 %v2950_v8  ;;  %v2954_v37 = vld [vmem:[#allocation10 + $0x78] sm:$0xff]  }
 0x182   : > { %531 = vrot.lane.b32.xlu0 %v3602_v40, %s3275_s29  ;;  %v576_v9 = vrot.slane %v3634_v54, 7  ;;  %v4171_v10 = vrot.slane %v3659_v2, 6  ;;  %v4170_v63 = vrot.slane %v3659_v2, 7  ;;  %v927_v11 = vsel %vm372_vm0, %v3595_v39, 0  ;;  %2607 = vmatpush3.bf16.msra.mxu0 %v2952_v16  ;;  %v896_v42 = vld [vmem:[#allocation3 + $0x1a] sm:$0xff] }
 0x183   : > { %v477_v12 = vrot.slane %v3562_v18, 5  ;;  %v479_v15 = vrot.slane %v3573_v27, 5  ;;  %2805 = vmatpush3.bf16.msra.mxu1 %v927_v11  ;;  %v656_v43 = vrot.slane %v3562_v18, 1  ;;  %v870_v11 = vld [vmem:[#allocation3 + $0x8] sm:$0xff]  ;;  %v475_v8 = vrot.slane %v3579_v30, 5  ;;  %2608 = vmatprep.subr.bf16.mxu0 %v2954_v37 }
 0x184   : > { %710 = vrot.lane.b32.xlu1 %v3610_v45, %s3275_s29  ;;  %v3762_v40 = vsel %vm564_vm3, %v574_v35, %v576_v9  ;;  %v3767_v23 = vsel %vm372_vm0, %v521_v41, %v4171_v10  ;;  %v3772_v39 = vsel %vm564_vm3, %v576_v9, %v4170_v63  ;;  %2634 = vmatprep.subr.bf16.mxu1 %v2939_v7  ;;  %v879_v45 = vld [vmem:[#allocation3 + $0x11] sm:$0xff]  ;;  %v880_v35 = vld [vmem:[#allocation3 + $0x19] sm:$0xff]  ;;  %v3277_v41 = vmov -inf   ;;  %v878_v7 = vld [vmem:[#allocation3 + $0x9] sm:$0xff] }
 0x185   : > { %v480_v36 = vsel %vm473_vm8, %v477_v12, %v479_v15  ;;  %851 = vst.msk [vmem:[#allocation3] sm:$0x1] %vm850_vm10, %v3277_v41  ;;  %852 = vst.msk [vmem:[#allocation3 + $0x41] sm:$0x1] %vm850_vm10, %v3277_v41  ;;  %v658_v9 = vrot.slane %v3573_v27, 1  ;;  %v2956_v63 = vld [vmem:[#allocation10 + $0x38] sm:$0xff]   ;;  %v887_v41 = vmax.f32 %v871_v32, %v879_v45  ;;  %v888_v18 = vmax.f32 %v872_v34, %v880_v35 }
 0x186   : > { %586 = vrot.lane.b32.xlu0 %v3615_v46, %s3276_s30  ;;  %503 = vst.msk [vmem:[#allocation2 + $0x50] sm:$0xff] %vm500_vm9, %v480_v36  ;;  %v660_v46 = vrot.slane %v3643_v59, 1  ;;  %v481_v27 = vrot.slane %v3643_v59, 5  ;;  %v895_v10 = vld [vmem:[#allocation3 + $0x12] sm:$0xff]  ;;  %v657_v30 = vsel %vm652_vm11, %v654_v14, %v656_v43  ;;  %v476_v16 = vsel %vm473_vm8, %v474_v25, %v475_v8  ;;  %2609 = vmatpush3.bf16.msra.mxu0 %v2956_v63 }
 0x187   : > { %v659_v36 = vsel %vm652_vm11, %v656_v43, %v658_v9  ;;  %v478_v32 = vsel %vm473_vm8, %v475_v8, %v477_v12  ;;  %v886_v34 = vmax.f32 %v870_v11, %v878_v7  ;;  %680 = vst.msk [vmem:[#allocation2 + $0x38] sm:$0xff] %vm500_vm9, %v657_v30  ;;  %501 = vst.msk [vmem:[#allocation2 + $0x30] sm:$0xff] %vm500_vm9, %v476_v16  ;;  %v662_v12 = vrot.slane %v3668_v6, 1  ;;  %v873_v7 = vld [vmem:[#allocation3 + $0x20] sm:$0xff]  ;;  %v874_v8 = vld [vmem:[#allocation3 + $0x28] sm:$0xff] }
 0x188   : > { %764 = vrot.lane.b32.xlu1 %v3618_v47, %s3276_s30  ;;  %681 = vst.msk [vmem:[#allocation2 + $0x48] sm:$0xff] %vm500_vm9, %v659_v36  ;;  %v655_v47 = vsel %vm652_vm11, %v653_v26, %v654_v14  ;;  %502 = vst.msk [vmem:[#allocation2 + $0x40] sm:$0xff] %vm500_vm9, %v478_v32  ;;  %v661_v25 = vsel %vm652_vm11, %v658_v9, %v660_v46  ;;  %v482_v20 = vsel %vm473_vm8, %v479_v15, %v481_v27  ;;  %v877_v14 = vld [vmem:[#allocation3 + $0x1] sm:$0xff]  ;;  %v894_v26 = vld [vmem:[#allocation3 + $0xa] sm:$0xff]  ;;  %vm839_vm0 = vcmask 1048324  }
 0x189   : > { %679 = vst.msk [vmem:[#allocation2 + $0x28] sm:$0xff] %vm500_vm9, %v655_v47  ;;  %682 = vst.msk [vmem:[#allocation2 + $0x58] sm:$0xff] %vm500_vm9, %v661_v25  ;;  %v666_v45 = vrot.slane %v3659_v2, 1  ;;  %v483_v35 = vrot.slane %v3668_v6, 5  ;;  %v893_v15 = vld [vmem:[#allocation3 + $0x2] sm:$0xff]  ;;  %v903_v37 = vmax.f32 %v887_v41, %v895_v10  ;;  %v904_v43 = vmax.f32 %v888_v18, %v896_v42  ;;  %v875_v25 = vld [vmem:[#allocation3 + $0x30] sm:$0xff] }
 0x18a   : > { %708 = vrot.lane.b32.xlu0 %v3621_v48, %s3275_s29  ;;  %504 = vst.msk [vmem:[#allocation2 + $0x60] sm:$0xff] %vm500_vm9, %v482_v20  ;;  %v664_v48 = vrot.slane %v3634_v54, 1  ;;  %v485_v63 = vrot.slane %v3634_v54, 5  ;;  %v487_v9 = vrot.slane %v3659_v2, 5  ;;  %v663_v47 = vsel %vm652_vm11, %v660_v46, %v662_v12  ;;  %v881_v10 = vld [vmem:[#allocation3 + $0x21] sm:$0xff]  ;;  %v882_v41 = vld [vmem:[#allocation3 + $0x29] sm:$0xff] }
 0x18b   : > { %v484_v16 = vsel %vm473_vm8, %v481_v27, %v483_v35  ;;  %687 = vst.msk [vmem:[#allocation2 + $0x98] sm:$0x7f] %vm686_vm12, %v666_v45  ;;  %v902_v42 = vmax.f32 %v886_v34, %v894_v26  ;;  %v897_v18 = vld [vmem:[#allocation3 + $0x22] sm:$0xff]  ;;  %v890_v32 = vmax.f32 %v874_v8, %v882_v41  ;;  %v898_v34 = vld [vmem:[#allocation3 + $0x2a] sm:$0xff]  ;;  %v876_v20 = vld [vmem:[#allocation3 + $0x38] sm:$0xff]  ;;  %v910_v26 = vpack.c.bf16 %v904_v43, %v903_v37 }
 0x18c   : > { %818 = vrot.lane.b32.xlu1 %v3625_v49, %s3274_s27  ;;  %v869_v11 = vld [vmem:[#allocation3] sm:$0xff]  ;;  %v665_v36 = vsel %vm652_vm11, %v662_v12, %v664_v48  ;;  %v667_v30 = vsel %vm652_vm11, %v664_v48, %v666_v45  ;;  %505 = vst.msk [vmem:[#allocation2 + $0x70] sm:$0xff] %vm500_vm9, %v484_v16  ;;  %683 = vst.msk [vmem:[#allocation2 + $0x68] sm:$0xff] %vm500_vm9, %v663_v47  ;;  %v486_v46 = vsel %vm473_vm8, %v483_v35, %v485_v63  ;;  %v883_v48 = vld [vmem:[#allocation3 + $0x31] sm:$0xff]  ;;  %vm607_vm2 = vcmask 785921  }
 0x18d   : > { %v885_v49 = vmax.f32 %v869_v11, %v877_v14  ;;  %684 = vst.msk [vmem:[#allocation2 + $0x78] sm:$0xff] %vm500_vm9, %v665_v36  ;;  %685 = vst.msk [vmem:[#allocation2 + $0x88] sm:$0xff] %vm500_vm9, %v667_v30  ;;  %v488_v27 = vsel %vm473_vm8, %v485_v63, %v487_v9  ;;  %v884_v12 = vld [vmem:[#allocation3 + $0x39] sm:$0xff]  ;;  %v906_v35 = vmax.f32 %v890_v32, %v898_v34  ;;  %v2951_v47 = vld [vmem:[#allocation10 + $0xd8] sm:$0xff]   ;;  %vm643_vm3 = vcmask 1048320  }
 0x18e   : > { %527 = vrot.lane.b32.xlu0 %v3628_v50, %s3275_s29  ;;  %509 = vst.msk [vmem:[#allocation2 + $0xa0] sm:$0x7] %vm508_vm13, %v487_v9  ;;  %v889_v50 = vmax.f32 %v873_v7, %v881_v10  ;;  %v891_v63 = vmax.f32 %v875_v25, %v883_v48  ;;  %v892_v9 = vmax.f32 %v876_v20, %v884_v12  ;;  %v2941_v7 = vld [vmem:[#allocation10 + $0x80] sm:$0xff]   ;;  %v899_v8 = vld [vmem:[#allocation3 + $0x32] sm:$0xff]  ;;  %v900_v36 = vld [vmem:[#allocation3 + $0x3a] sm:$0xff]  ;;  %vm554_vm4 = vcmask 523520  }
 0x18f   : > { %506 = vst.msk [vmem:[#allocation2 + $0x80] sm:$0xff] %vm500_vm9, %v486_v46  ;;  %507 = vst.msk [vmem:[#allocation2 + $0x90] sm:$0xff] %vm500_vm9, %v488_v27  ;;  %v901_v14 = vmax.f32 %v885_v49, %v893_v15  ;;  %v2943_v30 = vld [vmem:[#allocation10 + $0xc8] sm:$0xff]   ;;  %v2947_v37 = vld [vmem:[#allocation10 + $0xd0] sm:$0xff]   ;;  %vm609_vm5 = vcmask 785920   ;;  %vm740_vm6 = vcmask 521472  }
 0x190   : > { %706 = vrot.lane.b32.xlu1 %v3631_v51, %s3275_s29  ;;  %v905_v45 = vmax.f32 %v889_v50, %v897_v18  ;;  %v907_v51 = vmax.f32 %v891_v63, %v899_v8  ;;  %v908_v15 = vmax.f32 %v892_v9, %v900_v36  ;;  %v2958_v49 = vld [vmem:[#allocation10 + $0xe8] sm:$0xff]   ;;  %v2968_v41 = vld [vmem:[#allocation10 + $0x150] sm:$0xff]   ;;  %v2972_v50 = vld [vmem:[#allocation10 + $0x158] sm:$0xff]   ;;  %vm794_vm7 = vcmask 782848  }
 0x191   : > { %v909_v11 = vpack.c.bf16 %v902_v42, %v901_v14  ;;  %v2960_v42 = vld [vmem:[#allocation10 + $0xf0] sm:$0xff]   ;;  %v2967_v10 = vld [vmem:[#allocation10 + $0x108] sm:$0xff]   ;;  %v2973_v25 = vld [vmem:[#allocation10 + $0x118] sm:$0xff]   ;;  %vm848_vm8 = vcmask 1044224   ;;  %vm562_vm9 = vcmask 517376   ;;  %vm617_vm10 = vcmask 778752  }
 0x192   : > { %762 = vrot.lane.b32.xlu0 %v3646_v60, %s3276_s30  ;;  %v911_v16 = vpack.c.bf16 %v906_v35, %v905_v45  ;;  %v2945_v60 = vld [vmem:[#allocation10 + $0x88] sm:$0xff]   ;;  %v912_v43 = vpack.c.bf16 %v908_v15, %v907_v51  ;;  %v2969_v27 = vld [vmem:[#allocation10 + $0x110] sm:$0xff]   ;;  %v2976_v20 = vld [vmem:[#allocation10 + $0x160] sm:$0xff]  }
 0x193   : > { %2806 = vmatprep.mubr.msk.bf16.mxu1 %vm359_vm1, %v909_v11  ;;  %v2977_v48 = vld [vmem:[#allocation10 + $0x120] sm:$0xff]   ;;  %v2980_v12 = vld [vmem:[#allocation10 + $0x168] sm:$0xff]   ;;  %v2984_v9 = vld [vmem:[#allocation10 + $0x170] sm:$0xff]  }
 0x194   : > { %760 = vrot.lane.b32.xlu1 %v3649_v61, %s3276_s30  ;;  %2807 = vmatmul.mubr.msk.bf16.vlgmr.msra.gmra.mrb[0].mxu1 %vm359_vm1, %v910_v26  ;;  %v2949_v61 = vld [vmem:[#allocation10 + $0x90] sm:$0xff]   ;;  %v2981_v63 = vld [vmem:[#allocation10 + $0x128] sm:$0xff]   ;;  %v2988_v36 = vld [vmem:[#allocation10 + $0x178] sm:$0xff]  }
 0x195   : > { %2635 = vmatpush3.bf16.msra.mxu1 %v2941_v7  ;;  %2810 = vmatprep.mubr.msk.bf16.mxu1 %vm359_vm1, %v911_v16  ;;  %v2985_v8 = vld [vmem:[#allocation10 + $0x130] sm:$0xff]  }
 0x196   : > { %582 = vrot.lane.b32.xlu0 %v3654_v0, %s3276_s30  ;;  %2636 = vmatprep.subr.bf16.mxu1 %v2943_v30  ;;  %v2953_v0 = vld [vmem:[#allocation10 + $0x98] sm:$0xff]  }
 0x198   : > { %814 = vrot.lane.b32.xlu1 %v3657_v1, %s3274_s27  ;;  %v2955_v1 = vld [vmem:[#allocation10 + $0xe0] sm:$0xff]  }
 0x199   : > { %2637 = vmatpush3.bf16.msra.mxu1 %v2945_v60  ;;  %v2989_v60 = vld [vmem:[#allocation10 + $0x138] sm:$0xff]  }
 0x19a   : > { %816 = vrot.lane.b32.xlu0 %v3662_v3, %s3274_s27  ;;  %2638 = vmatprep.subr.bf16.mxu1 %v2947_v37  ;;  %v2957_v3 = vld [vmem:[#allocation10 + $0xa0] sm:$0xff]  }
 0x19c   : > { %529 = vrot.lane.b32.xlu1 %v3640_v58, %s3275_s29  ;;  %2811 = vmatmul.mubr.msk.bf16.gmra.mrb[4].mxu1 %vm359_vm1, %v912_v43  ;;  %v2964_v58 = vld [vmem:[#allocation10 + $0x140] sm:$0xff]   ;;  %vm552_vm1 = vcmask 523522  }
 0x19d   : > { %2639 = vmatpush3.bf16.msra.mxu1 %v2949_v61  ;;  %2674 = vmatprep.subr.bf16.mxu0 %v2964_v58 }
 0x19e   : > { %629 = vrot.lane.b32.xlu0 %v3668_v6, %s3274_s27  ;;  %2640 = vmatprep.subr.bf16.mxu1 %v2951_v47  ;;  %v2959_v6 = vld [vmem:[#allocation10 + $0xa8] sm:$0xff]  }
 0x1a0   : > { %584 = vrot.lane.b32.xlu1 %v3665_v4, %s3276_s30  ;;  %v2961_v4 = vld [vmem:[#allocation10 + $0xb0] sm:$0xff]  }
 0x1a1   : > { %2641 = vmatpush3.bf16.msra.mxu1 %v2953_v0 }
 0x1a2   : > { %712 = vrot.lane.b32.xlu0 %v3680_v17, %s3275_s29  ;;  %2642 = vmatprep.subr.bf16.mxu1 %v2955_v1  ;;  %v2962_v17 = vld [vmem:[#allocation10 + $0xf8] sm:$0xff]  }
 0x1a4   : > { %627 = vrot.lane.b32.xlu1 %v3643_v59, %s3274_s27  ;;  %v2963_v59 = vld [vmem:[#allocation10 + $0xb8] sm:$0xff]  }
 0x1a5   : > { %2643 = vmatpush3.bf16.msra.mxu1 %v2957_v3  ;;  %v2971_v3 = vld [vmem:[#allocation10 + $0x180] sm:$0xff]  }
 0x1a6   : > { %766 = vrot.lane.b32.xlu0 %v3683_v19, %s3276_s30  ;;  %2644 = vmatprep.subr.bf16.mxu1 %v2958_v49  ;;  %v2970_v19 = vld [vmem:[#allocation10 + $0x1c0] sm:$0xff]  }
 0x1a8   : > { %533 = vrot.lane.b32.xlu1 %v3688_v21, %s3275_s29  ;;  %v4194_v21 = vrot.slane %v3659_v2, 4 }
 0x1a9   : > { %2645 = vmatpush3.bf16.msra.mxu1 %v2959_v6  ;;  %v2974_v6 = vld [vmem:[#allocation10 + $0x1c8] sm:$0xff]  }
 0x1aa   : > { %820 = vrot.lane.b32.xlu0 %v3691_v22, %s3274_s27  ;;  %2646 = vmatprep.subr.bf16.mxu1 %v2960_v42  ;;  %v3949_v42 = vld [vmem:[#allocation10 + $0x240] sm:$0xff]  }
 0x1ac   : > { %588 = vrot.lane.b32.xlu1 %v3696_v24, %s3276_s30 }
 0x1ad   : > { %2647 = vmatpush3.bf16.msra.mxu1 %v2961_v4 }
 0x1ae   : > { %716 = vrot.lane.b32.xlu0 %v3699_v28, %s3275_s29  ;;  %2648 = vmatprep.subr.bf16.mxu1 %v2962_v17 }
 0x1b0   : > { %718 = vrot.lane.b32.xlu1 %v3704_v29, %s3275_s29 }
 0x1b1   : > { %2649 = vmatpush3.bf16.msra.mxu1 %v2963_v59 }
 0x1b2   : > { %535 = vrot.lane.b32.xlu0 %v3707_v31, %s3275_s29  ;;  %2714 = vmatprep.subr.bf16.mxu1 %v2970_v19  ;;  %v2975_v19 = vld [vmem:[#allocation10 + $0x188] sm:$0xff]  }
 0x1b4   : > { %714 = vrot.lane.b32.xlu1 %v3712_v33, %s3275_s29 }
 0x1b6   : > { %770 = vrot.lane.b32.xlu0 %v3723_v44, %s3276_s30 }
 0x1b8   : > { %768 = vrot.lane.b32.xlu1 %v3726_v52, %s3276_s30 }
 0x1ba   : > { %590 = vrot.lane.b32.xlu0 %v3729_v53, %s3276_s30 }
 0x1bc   : > { %822 = vrot.lane.b32.xlu1 %v3732_v56, %s3274_s27 }
 0x1be   : > { %824 = vrot.lane.b32.xlu0 %v3735_v57, %s3274_s27  ;;  %v4197_v57 = vmov 0.0  }
 0x1c0   : > { %772 = vrot.lane.b32.xlu1 %v3740_v62, %s3276_s30 }
 0x1c2   : > { %537 = vrot.lane.b32.xlu0 %v3743_v55, %s3275_s29  ;;  %v2965_v55 = vld [vmem:[#allocation10 + $0x100] sm:$0xff]  }
 0x1c4   : > { %826 = vrot.lane.b32.xlu1 %v3748_v5, %s3274_s27  ;;  %v2966_v5 = vld [vmem:[#allocation10 + $0x148] sm:$0xff]  }
 0x1c6   : > { %592 = vrot.lane.b32.xlu0 %v3762_v40, %s3276_s30 }
 0x1c8   : > { %720 = vrot.lane.b32.xlu1 %v702_v13, %s3275_s29  ;;  %v4195_v13 = vrot.slane %v3659_v2, 6 }
 0x1ca   : > { %631 = vrot.lane.b32.xlu0 %v3634_v54, %s3274_s27  ;;  %v4196_v54 = vrot.slane %v3659_v2, 7 }
 0x1cc   : > { %774 = vrot.lane.b32.xlu1 %v756_v38, %s3276_s30 }
 0x1ce   : > { %539 = vrot.lane.b32.xlu0 %v3767_v23, %s3275_s29  ;;  %v3278_v23 = vmov 0.0|0.0  }
 0x1d0   : > { %828 = vrot.lane.b32.xlu1 %v4194_v21, %s3274_s27  ;;  %v2978_v21 = vld [vmem:[#allocation10 + $0x1d0] sm:$0xff]  }
 0x1d2   : > { %594 = vrot.lane.b32.xlu0 %v3772_v39, %s3276_s30 }
 0x1d4   : > { %541 = vrot.lane.b32.xlu1 %v4195_v13, %s3275_s29  ;;  %s4039_s29 = scalar_lea.vmem [#allocation16], %s2479_s13  ;;  %s3279_s13 = smov [#allocation13]  }
 0x1d6   : > { %633 = vrot.lane.b32.xlu0 %v3659_v2, %s3274_s27  ;;  %s4036_s27 = scalar_lea.hbm %s4161_s4, %s2583_s10  ;;  %s4048_s10 = scalar_lea.hbm %s4162_s5, %s4173_s12 }
 0x1da   : > { %596 = vrot.lane.b32.xlu0 %v4196_v54, %s3276_s30  ;;  %s3135_s30 = sshll.u32 %s3279_s13, 4  ;;  %s3136_s30 = int_to_ptr.vmem [resolvable:$false] %s3135_s30 }
 0x1db   : > { %p3138_p3 = scmp.lt.s32.totalorder %s4025_s14, %s3136_s30 }
 0x1e2   : > { %v3913_v22 = vpop.permute.xlu1 %623 }
 0x1e4   : > { %v626_v24 = vpop.permute.xlu0 %625 }
 0x1e6   : > { %v620_v28 = vpop.permute.xlu1 %619 }
 0x1e8   : > { %v705_v29 = vpop.permute.xlu0 %704 }
 0x1e9   : > { %732 = vst.msk [vmem:[#allocation2 + $0x18] sm:$0xc0] %vm731_vm14, %v705_v29  ;;  %v2982_v29 = vld [vmem:[#allocation10 + $0x1d8] sm:$0xff]  }
 0x1ea   : > { %v813_v31 = vpop.permute.xlu1 %812 }
 0x1ec   : > { %v759_v33 = vpop.permute.xlu0 %758 }
 0x1ed   : > { %786 = vst.msk [vmem:[#allocation2 + $0x18] sm:$0xe0] %vm785_vm15, %v759_v33 }
 0x1ee   : > { %840 = vst.msk [vmem:[#allocation2 + $0x18] sm:$0xf0] %vm839_vm0, %v813_v31  ;;  %v526_v38 = vpop.permute.xlu1 %525 }
 0x1ef   : > { %553 = vst.msk [vmem:[#allocation2 + $0x20] sm:$0xfc] %vm552_vm1, %v526_v38  ;;  %v2983_v38 = vld [vmem:[#allocation10 + $0x198] sm:$0xff]  }
 0x1f0   : > { %v622_v44 = vpop.permute.xlu0 %621 }
 0x1f2   : > { %v581_v2 = vpop.permute.xlu1 %580 }
 0x1f3   : > { %608 = vst.msk [vmem:[#allocation2 + $0x20] sm:$0xfe] %vm607_vm2, %v581_v2 }
 0x1f4   : > { %644 = vst.msk [vmem:[#allocation2 + $0x20] sm:$0xff] %vm643_vm3, %v620_v28  ;;  %v532_v52 = vpop.permute.xlu0 %531  ;;  %v2979_v28 = vld [vmem:[#allocation10 + $0x190] sm:$0xff]  }
 0x1f5   : > { %557 = vst.msk [vmem:[#allocation2 + $0x50] sm:$0xff] %vm554_vm4, %v532_v52  ;;  %v3917_v53 = vld [vmem:[#allocation2 + $0x18] sm:$0xff] }
 0x1f6   : > { %v711_v56 = vpop.permute.xlu1 %710  ;;  %v1027_v62 = vpack.c.bf16 %v3917_v53, %v4197_v57 }
 0x1f7   : > { %735 = vst.msk [vmem:[#allocation2 + $0x48] sm:$0xff] %vm554_vm4, %v711_v56  ;;  %v2987_v56 = vld [vmem:[#allocation10 + $0x1a0] sm:$0xff]  }
 0x1f8   : > { %1194 = vmatprep.mubr.bf16.mxu0 %v1027_v62  ;;  %v587_v40 = vpop.permute.xlu0 %586 }
 0x1f9   : > { %612 = vst.msk [vmem:[#allocation2 + $0x50] sm:$0xff] %vm609_vm5, %v587_v40  ;;  %1195 = vmatmul.mubr.bf16.vlgmr.msra.gmra.mrb[8].mxu0 %v3278_v23 }
 0x1fa   : > { %647 = vst.msk [vmem:[#allocation2 + $0x50] sm:$0xff] %vm643_vm3, %v626_v24  ;;  %v765_v39 = vpop.permute.xlu1 %764  ;;  %2675 = vmatpush3.bf16.msra.mxu0 %v2965_v55  ;;  %v2990_v55 = vld [vmem:[#allocation10 + $0x1e8] sm:$0xff]  }
 0x1fb   : > { %789 = vst.msk [vmem:[#allocation2 + $0x48] sm:$0xff] %vm609_vm5, %v765_v39  ;;  %2676 = vmatprep.subr.bf16.mxu0 %v2966_v5  ;;  %v1245_v16 = vld [vmem:[#allocation2 + $0x20] sm:$0xff] }
 0x1fc   : > { %v709_v18 = vpop.permute.xlu0 %708  ;;  %v1267_v47 = vpack.c.bf16 %v1245_v16, %v4197_v57 }
 0x1fd   : > { %734 = vst.msk [vmem:[#allocation2 + $0x38] sm:$0xff] %vm554_vm4, %v709_v18 }
 0x1fe   : > { %v819_v46 = vpop.permute.xlu1 %818  ;;  %2677 = vmatpush3.bf16.msra.mxu0 %v2967_v10  ;;  %v2991_v10 = vld [vmem:[#allocation10 + $0x1a8] sm:$0xff]  }
 0x1ff   : > { %843 = vst.msk [vmem:[#allocation2 + $0x48] sm:$0xff] %vm643_vm3, %v819_v46  ;;  %2678 = vmatprep.subr.bf16.mxu0 %v2968_v41  ;;  %v2994_v41 = vld [vmem:[#allocation10 + $0x1f0] sm:$0xff]  }
 0x200   : > { %v528_v32 = vpop.permute.xlu0 %527 }
 0x201   : > { %555 = vst.msk [vmem:[#allocation2 + $0x30] sm:$0xff] %vm554_vm4, %v528_v32  ;;  %v1012_v62 = vld [vmem:[#allocation2 + $0x50] sm:$0xff] }
 0x202   : > { %v707_v34 = vpop.permute.xlu1 %706  ;;  %2679 = vmatpush3.bf16.msra.mxu0 %v2969_v27  ;;  %v2995_v27 = vld [vmem:[#allocation10 + $0x1b0] sm:$0xff]  }
 0x203   : > { %733 = vst.msk [vmem:[#allocation2 + $0x28] sm:$0xff] %vm554_vm4, %v707_v34  ;;  %2680 = vmatprep.subr.bf16.mxu0 %v2972_v50  ;;  %v2998_v50 = vld [vmem:[#allocation10 + $0x1f8] sm:$0xff]  }
 0x204   : > { %v763_v14 = vpop.permute.xlu0 %762 }
 0x205   : > { %788 = vst.msk [vmem:[#allocation2 + $0x38] sm:$0xff] %vm609_vm5, %v763_v14 }
 0x206   : > { %v761_v26 = vpop.permute.xlu1 %760  ;;  %2681 = vmatpush3.bf16.msra.mxu0 %v2973_v25  ;;  %v1250_v1 = vld [vmem:[#allocation2 + $0x48] sm:$0xff] }
 0x207   : > { %787 = vst.msk [vmem:[#allocation2 + $0x28] sm:$0xff] %vm609_vm5, %v761_v26  ;;  %2682 = vmatprep.subr.bf16.mxu0 %v2976_v20  ;;  %v2999_v25 = vld [vmem:[#allocation10 + $0x1b8] sm:$0xff]  }
 0x208   : > { %v583_v45 = vpop.permute.xlu0 %582 }
 0x209   : > { %610 = vst.msk [vmem:[#allocation2 + $0x30] sm:$0xff] %vm609_vm5, %v583_v45 }
 0x20a   : > { %645 = vst.msk [vmem:[#allocation2 + $0x30] sm:$0xff] %vm643_vm3, %v622_v44  ;;  %v815_v35 = vpop.permute.xlu1 %814  ;;  %2683 = vmatpush3.bf16.msra.mxu0 %v2977_v48  ;;  %v2986_v44 = vld [vmem:[#allocation10 + $0x1e0] sm:$0xff]  }
 0x20b   : > { %841 = vst.msk [vmem:[#allocation2 + $0x28] sm:$0xff] %vm643_vm3, %v815_v35  ;;  %2684 = vmatprep.subr.bf16.mxu0 %v2980_v12 }
 0x20c   : > { %v817_v11 = vpop.permute.xlu0 %816 }
 0x20d   : > { %842 = vst.msk [vmem:[#allocation2 + $0x38] sm:$0xff] %vm643_vm3, %v817_v11 }
 0x20e   : > { %v530_v7 = vpop.permute.xlu1 %529  ;;  %2685 = vmatpush3.bf16.msra.mxu0 %v2981_v63 }
 0x20f   : > { %556 = vst.msk [vmem:[#allocation2 + $0x40] sm:$0xff] %vm554_vm4, %v530_v7  ;;  %2686 = vmatprep.subr.bf16.mxu0 %v2984_v9 }
 0x210   : > { %v3937_v30 = vpop.permute.xlu0 %629 }
 0x211   : > { %v1008_v43 = vld [vmem:[#allocation2 + $0x30] sm:$0xff] }
 0x212   : > { %v585_v51 = vpop.permute.xlu1 %584  ;;  %v1246_v15 = vld [vmem:[#allocation2 + $0x28] sm:$0xff]  ;;  %2687 = vmatpush3.bf16.msra.mxu0 %v2985_v8  ;;  %v3951_v17 = vpack.c.bf16 %v1008_v43, %v1245_v16 }
 0x213   : > { %611 = vst.msk [vmem:[#allocation2 + $0x40] sm:$0xff] %vm609_vm5, %v585_v51  ;;  %v1268_v37 = vpack.c.bf16 %v1246_v15, %v3917_v53  ;;  %2688 = vmatprep.subr.bf16.mxu0 %v2988_v36 }
 0x214   : > { %646 = vst.msk [vmem:[#allocation2 + $0x40] sm:$0xff] %vm643_vm3, %v3913_v22  ;;  %v713_v61 = vpop.permute.xlu0 %712  ;;  %v1009_v0 = vld [vmem:[#allocation2 + $0x38] sm:$0xff] }
 0x215   : > { %736 = vst.msk [vmem:[#allocation2 + $0x58] sm:$0xff] %vm554_vm4, %v713_v61  ;;  %1436 = vmatprep.mubr.bf16.mxu1 %v1268_v37  ;;  %v3945_v49 = vpack.c.bf16 %v1009_v0, %v1246_v15  ;;  %v3947_v58 = vpack.c.bf16 %v1250_v1, %v1009_v0  ;;  %v2993_v37 = vld [vmem:[#allocation10 + $0x200] sm:$0xff]   ;;  %v2996_v61 = vld [vmem:[#allocation10 + $0x248] sm:$0xff]  }
 0x216   : > { %1437 = vmatmul.mubr.bf16.vlgmr.msra.gmra.mrb[8].mxu1 %v1267_v47  ;;  %v628_v4 = vpop.permute.xlu1 %627  ;;  %2689 = vmatpush3.bf16.msra.mxu0 %v2989_v60 }
 0x217   : > { %1202 = vmatprep.mubr.bf16.mxu0 %v3945_v49  ;;  %1444 = vmatprep.mubr.bf16.mxu1 %v3947_v58 }
 0x218   : > { %1203 = vmatmul.mubr.bf16.gmra.mrb[12].mxu0 %v3951_v17  ;;  %v767_v59 = vpop.permute.xlu0 %766  ;;  %2715 = vmatpush3.bf16.msra.mxu1 %v2971_v3  ;;  %v2997_v3 = vld [vmem:[#allocation10 + $0x208] sm:$0xff]  }
 0x219   : > { %790 = vst.msk [vmem:[#allocation2 + $0x58] sm:$0xff] %vm609_vm5, %v767_v59  ;;  %2716 = vmatprep.subr.bf16.mxu1 %v2974_v6  ;;  %2754 = vmatprep.subr.bf16.mxu0 %v3949_v42  ;;  %v3000_v6 = vld [vmem:[#allocation10 + $0x250] sm:$0xff]  }
 0x21a   : > { %v534_v13 = vpop.permute.xlu1 %533 }
 0x21b   : > { %558 = vst.msk [vmem:[#allocation2 + $0x60] sm:$0xff] %vm554_vm4, %v534_v13  ;;  %v1249_v54 = vld [vmem:[#allocation2 + $0x40] sm:$0xff]  ;;  %v3005_v13 = vld [vmem:[#allocation10 + $0x220] sm:$0xff]  }
 0x21c   : > { %v821_v22 = vpop.permute.xlu0 %820  ;;  %v3959_v24 = vpack.c.bf16 %v1249_v54, %v1008_v43  ;;  %2717 = vmatpush3.bf16.msra.mxu1 %v2975_v19  ;;  %v3970_v40 = vpack.c.bf16 %v1012_v62, %v1249_v54  ;;  %v3003_v19 = vld [vmem:[#allocation10 + $0x218] sm:$0xff]   ;;  %v3006_v54 = vld [vmem:[#allocation10 + $0x268] sm:$0xff]  }
 0x21d   : > { %844 = vst.msk [vmem:[#allocation2 + $0x58] sm:$0xff] %vm643_vm3, %v821_v22  ;;  %2718 = vmatprep.subr.bf16.mxu1 %v2978_v21  ;;  %v3004_v21 = vld [vmem:[#allocation10 + $0x260] sm:$0xff]  }
 0x21e   : > { %1445 = vmatmul.mubr.bf16.gmra.mrb[12].mxu1 %v3959_v24  ;;  %v589_v31 = vpop.permute.xlu1 %588 }
 0x21f   : > { %613 = vst.msk [vmem:[#allocation2 + $0x60] sm:$0xff] %vm609_vm5, %v589_v31  ;;  %v3009_v31 = vld [vmem:[#allocation10 + $0x230] sm:$0xff]  }
 0x220   : > { %648 = vst.msk [vmem:[#allocation2 + $0x60] sm:$0xff] %vm643_vm3, %v628_v4  ;;  %v717_v33 = vpop.permute.xlu0 %716  ;;  %2719 = vmatpush3.bf16.msra.mxu1 %v2979_v28  ;;  %v3001_v4 = vld [vmem:[#allocation10 + $0x210] sm:$0xff]   ;;  %v3007_v28 = vld [vmem:[#allocation10 + $0x228] sm:$0xff]  }
 0x221   : > { %738 = vst.msk [vmem:[#allocation2 + $0x78] sm:$0xff] %vm554_vm4, %v717_v33  ;;  %2720 = vmatprep.subr.bf16.mxu1 %v2982_v29  ;;  %v3008_v29 = vld [vmem:[#allocation10 + $0x270] sm:$0xff]  }
 0x222   : > { %v719_v2 = vpop.permute.xlu1 %718 }
 0x223   : > { %739 = vst.msk [vmem:[#allocation2 + $0x88] sm:$0xff] %vm554_vm4, %v719_v2  ;;  %v3016_v2 = vld [vmem:[#allocation2] sm:$0xff] }
 0x224   : > { %v536_v52 = vpop.permute.xlu0 %535  ;;  %v1013_v53 = vld [vmem:[#allocation2 + $0x58] sm:$0xff]  ;;  %2721 = vmatpush3.bf16.msra.mxu1 %v2983_v38  ;;  %v3010_v38 = vld [vmem:[#allocation10 + $0x278] sm:$0xff]  }
 0x225   : > { %559 = vst.msk [vmem:[#allocation2 + $0x70] sm:$0xff] %vm554_vm4, %v536_v52  ;;  %v3968_v57 = vpack.c.bf16 %v1013_v53, %v1250_v1  ;;  %2722 = vmatprep.subr.bf16.mxu1 %v2986_v44  ;;  %v3011_v44 = vld [vmem:[#allocation10 + $0x238] sm:$0xff]  }
 0x226   : > { %v715_v5 = vpop.permute.xlu1 %714 }
 0x227   : > { %737 = vst.msk [vmem:[#allocation2 + $0x68] sm:$0xff] %vm554_vm4, %v715_v5  ;;  %1210 = vmatprep.mubr.bf16.mxu0 %v3968_v57  ;;  %v1253_v26 = vld [vmem:[#allocation2 + $0x60] sm:$0xff] }
 0x228   : > { %1211 = vmatmul.mubr.bf16.gmra.mrb[16].mxu0 %v3970_v40  ;;  %v771_v39 = vpop.permute.xlu0 %770  ;;  %2723 = vmatpush3.bf16.msra.mxu1 %v2987_v56  ;;  %v3986_v9 = vpack.c.bf16 %v1253_v26, %v1012_v62 }
 0x229   : > { %792 = vst.msk [vmem:[#allocation2 + $0x78] sm:$0xff] %vm609_vm5, %v771_v39  ;;  %2724 = vmatprep.subr.bf16.mxu1 %v2990_v55 }
 0x22a   : > { %v769_v18 = vpop.permute.xlu1 %768 }
 0x22b   : > { %791 = vst.msk [vmem:[#allocation2 + $0x68] sm:$0xff] %vm609_vm5, %v769_v18 }
 0x22c   : > { %v591_v46 = vpop.permute.xlu0 %590  ;;  %2725 = vmatpush3.bf16.msra.mxu1 %v2991_v10 }
 0x22d   : > { %614 = vst.msk [vmem:[#allocation2 + $0x70] sm:$0xff] %vm609_vm5, %v591_v46  ;;  %2726 = vmatprep.subr.bf16.mxu1 %v2994_v41 }
 0x22e   : > { %649 = vst.msk [vmem:[#allocation2 + $0x70] sm:$0xff] %vm643_vm3, %v3937_v30  ;;  %v823_v32 = vpop.permute.xlu1 %822 }
 0x22f   : > { %845 = vst.msk [vmem:[#allocation2 + $0x68] sm:$0xff] %vm643_vm3, %v823_v32 }
 0x230   : > { %v825_v34 = vpop.permute.xlu0 %824  ;;  %2727 = vmatpush3.bf16.msra.mxu1 %v2995_v27 }
 0x231   : > { %846 = vst.msk [vmem:[#allocation2 + $0x78] sm:$0xff] %vm643_vm3, %v825_v34  ;;  %2728 = vmatprep.subr.bf16.mxu1 %v2998_v50 }
 0x232   : > { %v773_v20 = vpop.permute.xlu1 %772 }
 0x233   : > { %793 = vst.msk [vmem:[#allocation2 + $0x88] sm:$0xff] %vm609_vm5, %v773_v20 }
 0x234   : > { %v538_v14 = vpop.permute.xlu0 %537  ;;  %2729 = vmatpush3.bf16.msra.mxu1 %v2999_v25 }
 0x235   : > { %560 = vst.msk [vmem:[#allocation2 + $0x80] sm:$0xff] %vm554_vm4, %v538_v14  ;;  %2814 = vmatprep.subr.bf16.mxu1 %v3949_v42  ;;  %v1016_v35 = vld [vmem:[#allocation2 + $0x70] sm:$0xff] }
 0x236   : > { %v827_v48 = vpop.permute.xlu1 %826  ;;  %v1254_v12 = vld [vmem:[#allocation2 + $0x68] sm:$0xff]  ;;  %v3992_v36 = vpack.c.bf16 %v1016_v35, %v1253_v26 }
 0x237   : > { %847 = vst.msk [vmem:[#allocation2 + $0x88] sm:$0xff] %vm643_vm3, %v827_v48  ;;  %v1272_v45 = vpack.c.bf16 %v1254_v12, %v1013_v53 }
 0x238   : > { %v593_v63 = vpop.permute.xlu0 %592  ;;  %v1017_v11 = vld [vmem:[#allocation2 + $0x78] sm:$0xff] }
 0x239   : > { %615 = vst.msk [vmem:[#allocation2 + $0x80] sm:$0xff] %vm609_vm5, %v593_v63  ;;  %1452 = vmatprep.mubr.bf16.mxu1 %v1272_v45  ;;  %v3989_v7 = vpack.c.bf16 %v1017_v11, %v1254_v12 }
 0x23a   : > { %v721_v8 = vpop.permute.xlu1 %720  ;;  %1453 = vmatmul.mubr.bf16.gmra.mrb[16].mxu1 %v3986_v9 }
 0x23b   : > { %741 = vst.msk [vmem:[#allocation2 + $0x98] sm:$0x3f] %vm740_vm6, %v721_v8  ;;  %1218 = vmatprep.mubr.bf16.mxu0 %v3989_v7 }
 0x23c   : > { %v632_v30 = vpop.permute.xlu0 %631  ;;  %1219 = vmatmul.mubr.bf16.gmra.mrb[20].mxu0 %v3992_v36 }
 0x23d   : > { %650 = vst.msk [vmem:[#allocation2 + $0x80] sm:$0xff] %vm643_vm3, %v632_v30  ;;  %1678 = vmatprep.mubr.bf16.mxu0 %v3945_v49 }
 0x23e   : > { %v775_v16 = vpop.permute.xlu1 %774  ;;  %v1258_v51 = vld [vmem:[#allocation2 + $0x88] sm:$0xff] }
 0x23f   : > { %795 = vst.msk [vmem:[#allocation2 + $0x98] sm:$0x1f] %vm794_vm7, %v775_v16  ;;  %v1274_v15 = vpack.c.bf16 %v1258_v51, %v1017_v11 }
 0x240   : > { %v540_v60 = vpop.permute.xlu0 %539 }
 0x241   : > { %561 = vst.msk [vmem:[#allocation2 + $0x90] sm:$0xff] %vm554_vm4, %v540_v60  ;;  %1460 = vmatprep.mubr.bf16.mxu1 %v1274_v15 }
 0x242   : > { %v829_v43 = vpop.permute.xlu1 %828 }
 0x243   : > { %849 = vst.msk [vmem:[#allocation2 + $0x98] sm:$0xf] %vm848_vm8, %v829_v43 }
 0x244   : > { %v595_v47 = vpop.permute.xlu0 %594  ;;  %1679 = vmatmul.mubr.bf16.vlgmr.msra.gmra.mrb[24].mxu0 %v3951_v17  ;;  %v1257_v0 = vld [vmem:[#allocation2 + $0x80] sm:$0xff] }
 0x245   : > { %616 = vst.msk [vmem:[#allocation2 + $0x90] sm:$0xff] %vm609_vm5, %v595_v47  ;;  %1686 = vmatprep.mubr.bf16.mxu0 %v3968_v57  ;;  %2755 = vmatpush3.bf16.msra.mxu0 %v2993_v37  ;;  %v1273_v1 = vpack.c.bf16 %v1257_v0, %v1016_v35  ;;  %v3002_v17 = vld [vmem:[#allocation10 + $0x258] sm:$0xff]  }
 0x246   : > { %v542_v49 = vpop.permute.xlu1 %541  ;;  %2756 = vmatprep.subr.bf16.mxu0 %v2996_v61 }
 0x247   : > { %563 = vst.msk [vmem:[#allocation2 + $0xa0] sm:$0x3] %vm562_vm9, %v542_v49  ;;  %1461 = vmatmul.mubr.bf16.gmra.mrb[20].mxu1 %v1273_v1 }
 0x248   : > { %v634_v42 = vpop.permute.xlu0 %633  ;;  %1920 = vmatprep.mubr.bf16.mxu1 %v3947_v58 }
 0x249   : > { %651 = vst.msk [vmem:[#allocation2 + $0x90] sm:$0xff] %vm643_vm3, %v634_v42  ;;  %2757 = vmatpush3.bf16.msra.mxu0 %v2997_v3 }
 0x24a   : > { %2758 = vmatprep.subr.bf16.mxu0 %v3000_v6  ;;  %v1500_v58 = vld [vmem:[#allocation2 + $0x98] sm:$0xff] }
 0x24b   : > { %v1516_v22 = vpack.c.bf16 %v1500_v58, %v1258_v51  ;;  %v1758_v52 = vpack.c.bf16 %v3016_v2, %v1500_v58 }
 0x24c   : > { %v597_v59 = vpop.permute.xlu0 %596  ;;  %1687 = vmatmul.mubr.bf16.gmra.mrb[28].mxu0 %v3970_v40 }
 0x24d   : > { %618 = vst.msk [vmem:[#allocation2 + $0xa0] sm:$0x1] %vm617_vm10, %v597_v59  ;;  %1694 = vmatprep.mubr.bf16.mxu0 %v3989_v7  ;;  %2759 = vmatpush3.bf16.msra.mxu0 %v3001_v4 }
 0x24e   : > { %2760 = vmatprep.subr.bf16.mxu0 %v3002_v17 }
 0x24f   : > { %1921 = vmatmul.mubr.bf16.vlgmr.msra.gmra.mrb[24].mxu1 %v3959_v24 }
 0x250   : > { %2822 = vmatpush3.bf16.msra.mxu1 %v2993_v37  ;;  %1928 = vmatprep.mubr.bf16.mxu1 %v1272_v45  ;;  %v1499_v24 = vld [vmem:[#allocation2 + $0x90] sm:$0xff] }
 0x251   : > { %2761 = vmatpush3.bf16.msra.mxu0 %v3003_v19  ;;  %2815 = vmatprep.subr.bf16.mxu1 %v2996_v61  ;;  %v1515_v33 = vpack.c.bf16 %v1499_v24, %v1257_v0 }
 0x252   : > { %2762 = vmatprep.subr.bf16.mxu0 %v3004_v21 }
 0x254   : > { %2823 = vmatpush3.bf16.msra.mxu1 %v2997_v3  ;;  %1695 = vmatmul.mubr.bf16.gmra.mrb[32].mxu0 %v3992_v36  ;;  %v1741_v53 = vld [vmem:[#allocation2 + $0xa0] sm:$0xff] }
 0x255   : > { %1702 = vmatprep.mubr.bf16.mxu0 %v1516_v22  ;;  %2763 = vmatpush3.bf16.msra.mxu0 %v3005_v13  ;;  %v1757_v56 = vpack.c.bf16 %v1741_v53, %v1499_v24  ;;  %v1999_v18 = vpack.c.bf16 %v3016_v2, %v1741_v53 }
 0x256   : > { %2816 = vmatprep.subr.bf16.mxu1 %v3000_v6  ;;  %2764 = vmatprep.subr.bf16.mxu0 %v3006_v54 }
 0x257   : > { %1929 = vmatmul.mubr.bf16.gmra.mrb[28].mxu1 %v3986_v9 }
 0x258   : > { %2824 = vmatpush3.bf16.msra.mxu1 %v3001_v4  ;;  %1936 = vmatprep.mubr.bf16.mxu1 %v1274_v15 }
 0x259   : > { %2765 = vmatpush3.bf16.msra.mxu0 %v3007_v28  ;;  %2817 = vmatprep.subr.bf16.mxu1 %v3002_v17 }
 0x25a   : > { %2766 = vmatprep.subr.bf16.mxu0 %v3008_v29 }
 0x25c   : > { %2825 = vmatpush3.bf16.msra.mxu1 %v3003_v19  ;;  %1703 = vmatmul.mubr.bf16.gmra.mrb[36].mxu0 %v1515_v33 }
 0x25d   : > { %2767 = vmatpush3.bf16.msra.mxu0 %v3009_v31  ;;  %2162 = vmatprep.mubr.bf16.mxu0 %v3968_v57 }
 0x25e   : > { %2818 = vmatprep.subr.bf16.mxu1 %v3004_v21  ;;  %2768 = vmatprep.subr.bf16.mxu0 %v3010_v38 }
 0x25f   : > { %1937 = vmatmul.mubr.bf16.gmra.mrb[32].mxu1 %v1273_v1 }
 0x260   : > { %2826 = vmatpush3.bf16.msra.mxu1 %v3005_v13  ;;  %1944 = vmatprep.mubr.bf16.mxu1 %v1758_v52 }
 0x261   : > { %2769 = vmatpush3.bf16.msra.mxu0 %v3011_v44  ;;  %2819 = vmatprep.subr.bf16.mxu1 %v3006_v54 }
 0x264   : > { %2827 = vmatpush3.bf16.msra.mxu1 %v3007_v28  ;;  %2163 = vmatmul.mubr.bf16.vlgmr.msra.gmra.mrb[40].mxu0 %v3970_v40 }
 0x265   : > { %2170 = vmatprep.mubr.bf16.mxu0 %v3989_v7  ;;  %2820 = vmatprep.subr.bf16.mxu1 %v3008_v29 }
 0x267   : > { %1945 = vmatmul.mubr.bf16.gmra.mrb[36].mxu1 %v1757_v56  ;;  %v2808_v57 = vpop.f32.mrb[0].mxu1 }
 0x268   : > { %2828 = vmatpush3.bf16.msra.mxu1 %v3009_v31  ;;  %2178 = vmatprep.mubr.bf16.mxu1 %v1516_v22  ;;  %v963_v62 = vpop.f32.mrb[1].mxu1 }
 0x269   : > { %2821 = vmatprep.subr.bf16.mxu1 %v3010_v38  ;;  %v2809_v55 = vpop.f32.mrb[2].mxu1 }
 0x26a   : > { %v966_v5 = vpop.f32.mrb[3].mxu1 }
 0x26c   : > { %2829 = vmatpush3.bf16.msra.mxu1 %v3011_v44  ;;  %2171 = vmatmul.mubr.bf16.gmra.mrb[44].mxu0 %v3992_v36 }
 0x26f   : > { %2179 = vmatmul.mubr.bf16.vlgmr.msra.gmra.mrb[40].mxu1 %v1515_v33  ;;  %v2812_v39 = vpop.f32.mrb[4].mxu1 }
 0x270   : > { %2186 = vmatprep.mubr.bf16.mxu1 %v3278_v23  ;;  %v979_v40 = vpop.f32.mrb[5].mxu1 }
 0x271   : > { %v2813_v10 = vpop.f32.mrb[6].mxu1 }
 0x272   : > { %v982_v41 = vpop.f32.mrb[7].mxu1 }
 0x277   : > { %2187 = vmatmul.mubr.bf16.gmra.mrb[44].mxu1 %v1999_v18 }
 0x2cc   : > { %v2610_v46 = vpop.f32.mrb[8].mxu0 }
 0x2cd   : > { %v2611_v27 = vpop.f32.mrb[9].mxu0 }
 0x2ce   : > { %v2612_v50 = vadd.f32 %v2611_v27, %v2610_v46  ;;  %v2613_v32 = vpop.f32.mrb[10].mxu0 }
 0x2cf   : > { %v2614_v34 = vpop.f32.mrb[11].mxu0 }
 0x2d0   : > { %v1227_v25 = vadd.f32 %v2612_v50, %v963_v62  ;;  %v2615_v20 = vadd.f32 %v2614_v34, %v2613_v32 }
 0x2d2   : > { %v1228_v14 = vadd.f32 %v2615_v20, %v966_v5 }
 0x2e9   : > { %v2650_v26 = vpop.f32.mrb[8].mxu1 }
 0x2ea   : > { %v2651_v48 = vpop.f32.mrb[9].mxu1 }
 0x2eb   : > { %v2652_v12 = vadd.f32 %v2651_v48, %v2650_v26  ;;  %v2616_v45 = vpop.f32.mrb[12].mxu0  ;;  %v2653_v35 = vpop.f32.mrb[10].mxu1 }
 0x2ec   : > { %v2617_v23 = vpop.f32.mrb[13].mxu0  ;;  %v2654_v63 = vpop.f32.mrb[11].mxu1 }
 0x2ed   : > { %v1469_v9 = vadd.f32 %v2652_v12, %v1227_v25  ;;  %v2618_v11 = vadd.f32 %v2617_v23, %v2616_v45  ;;  %v2655_v7 = vadd.f32 %v2654_v63, %v2653_v35  ;;  %v2619_v8 = vpop.f32.mrb[14].mxu0 }
 0x2ee   : > { %v2620_v36 = vpop.f32.mrb[15].mxu0 }
 0x2ef   : > { %v1229_v30 = vadd.f32 %v2808_v57, %v2618_v11  ;;  %v1470_v16 = vadd.f32 %v2655_v7, %v1228_v14  ;;  %v2621_v51 = vadd.f32 %v2620_v36, %v2619_v8 }
 0x2f1   : > { %v1230_v15 = vadd.f32 %v2809_v55, %v2621_v51  ;;  %v2656_v60 = vpop.f32.mrb[12].mxu1 }
 0x2f2   : > { %v2657_v37 = vpop.f32.mrb[13].mxu1 }
 0x2f3   : > { %v2658_v43 = vadd.f32 %v2657_v37, %v2656_v60  ;;  %v2659_v61 = vpop.f32.mrb[14].mxu1 }
 0x2f4   : > { %v2660_v47 = vpop.f32.mrb[15].mxu1 }
 0x2f5   : > { %v1471_v0 = vadd.f32 %v2658_v43, %v1229_v30  ;;  %v2661_v1 = vadd.f32 %v2660_v47, %v2659_v61 }
 0x2f7   : > { %v1472_v3 = vadd.f32 %v2661_v1, %v1230_v15 }
 0x2fb   : > { %v2622_v49 = vpop.f32.mrb[16].mxu0 }
 0x2fc   : > { %v2623_v6 = vpop.f32.mrb[17].mxu0 }
 0x2fd   : > { %v2624_v42 = vadd.f32 %v2623_v6, %v2622_v49  ;;  %v2625_v4 = vpop.f32.mrb[18].mxu0 }
 0x2fe   : > { %v2626_v17 = vpop.f32.mrb[19].mxu0 }
 0x2ff   : > { %v1231_v59 = vadd.f32 %v2624_v42, %v979_v40  ;;  %v2627_v19 = vadd.f32 %v2626_v17, %v2625_v4 }
 0x301   : > { %v1232_v21 = vadd.f32 %v2627_v19, %v982_v41 }
 0x30d   : > { %v2662_v58 = vpop.f32.mrb[16].mxu1 }
 0x30e   : > { %v2663_v13 = vpop.f32.mrb[17].mxu1 }
 0x30f   : > { %v2664_v54 = vadd.f32 %v2663_v13, %v2662_v58  ;;  %v2628_v22 = vpop.f32.mrb[20].mxu0  ;;  %v2665_v28 = vpop.f32.mrb[18].mxu1 }
 0x310   : > { %v2629_v29 = vpop.f32.mrb[21].mxu0  ;;  %v2666_v24 = vpop.f32.mrb[19].mxu1 }
 0x311   : > { %v1473_v31 = vadd.f32 %v2664_v54, %v1231_v59  ;;  %v2630_v33 = vadd.f32 %v2629_v29, %v2628_v22  ;;  %v2667_v38 = vadd.f32 %v2666_v24, %v2665_v28  ;;  %v2631_v44 = vpop.f32.mrb[22].mxu0 }
 0x312   : > { %v2632_v2 = vpop.f32.mrb[23].mxu0 }
 0x313   : > { %v1233_v52 = vadd.f32 %v2812_v39, %v2630_v33  ;;  %v1474_v53 = vadd.f32 %v2667_v38, %v1232_v21  ;;  %v2633_v56 = vadd.f32 %v2632_v2, %v2631_v44 }
 0x315   : > { %v1234_v57 = vadd.f32 %v2813_v10, %v2633_v56 }
 0x317   : > { %v2690_v62 = vpop.f32.mrb[24].mxu0 }
 0x318   : > { %v2691_v55 = vpop.f32.mrb[25].mxu0 }
 0x319   : > { %v2692_v5 = vadd.f32 %v2691_v55, %v2690_v62  ;;  %v2693_v40 = vpop.f32.mrb[26].mxu0 }
 0x31a   : > { %v2668_v41 = vpop.f32.mrb[20].mxu1  ;;  %v2694_v18 = vpop.f32.mrb[27].mxu0 }
 0x31b   : > { %v1711_v46 = vadd.f32 %v2692_v5, %v1469_v9  ;;  %v2695_v27 = vadd.f32 %v2694_v18, %v2693_v40  ;;  %v2669_v50 = vpop.f32.mrb[21].mxu1 }
 0x31c   : > { %v2670_v32 = vadd.f32 %v2669_v50, %v2668_v41  ;;  %v2671_v34 = vpop.f32.mrb[22].mxu1 }
 0x31d   : > { %v1712_v25 = vadd.f32 %v2695_v27, %v1470_v16  ;;  %v2672_v20 = vpop.f32.mrb[23].mxu1 }
 0x31e   : > { %v1475_v14 = vadd.f32 %v2670_v32, %v1233_v52  ;;  %v2673_v26 = vadd.f32 %v2672_v20, %v2671_v34 }
 0x31f   : > { %v2696_v48 = vpop.f32.mrb[28].mxu0 }
 0x320   : > { %v1476_v39 = vadd.f32 %v2673_v26, %v1234_v57  ;;  %v2697_v12 = vpop.f32.mrb[29].mxu0 }
 0x321   : > { %v2698_v45 = vadd.f32 %v2697_v12, %v2696_v48  ;;  %v2699_v10 = vpop.f32.mrb[30].mxu0 }
 0x322   : > { %v2700_v35 = vpop.f32.mrb[31].mxu0  ;;  %v2730_v23 = vpop.f32.mrb[24].mxu1 }
 0x323   : > { %v1713_v63 = vadd.f32 %v2698_v45, %v1471_v0  ;;  %v2701_v11 = vadd.f32 %v2700_v35, %v2699_v10  ;;  %v2731_v7 = vpop.f32.mrb[25].mxu1 }
 0x324   : > { %v2732_v8 = vadd.f32 %v2731_v7, %v2730_v23  ;;  %v2733_v9 = vpop.f32.mrb[26].mxu1 }
 0x325   : > { %v1714_v36 = vadd.f32 %v2701_v11, %v1472_v3  ;;  %v2734_v30 = vpop.f32.mrb[27].mxu1 }
 0x326   : > { %v1953_v51 = vadd.f32 %v2732_v8, %v1711_v46  ;;  %v2735_v15 = vadd.f32 %v2734_v30, %v2733_v9 }
 0x327   : > { %v2702_v16 = vpop.f32.mrb[32].mxu0 }
 0x328   : > { %v1954_v60 = vadd.f32 %v2735_v15, %v1712_v25  ;;  %v2703_v37 = vpop.f32.mrb[33].mxu0 }
 0x329   : > { %v2704_v43 = vadd.f32 %v2703_v37, %v2702_v16  ;;  %v2705_v61 = vpop.f32.mrb[34].mxu0 }
 0x32a   : > { %v2706_v47 = vpop.f32.mrb[35].mxu0  ;;  %v2736_v1 = vpop.f32.mrb[28].mxu1 }
 0x32b   : > { %v1715_v49 = vadd.f32 %v2704_v43, %v1473_v31  ;;  %v2707_v6 = vadd.f32 %v2706_v47, %v2705_v61  ;;  %v2737_v42 = vpop.f32.mrb[29].mxu1 }
 0x32c   : > { %v2738_v4 = vadd.f32 %v2737_v42, %v2736_v1  ;;  %v2739_v0 = vpop.f32.mrb[30].mxu1 }
 0x32d   : > { %v1716_v17 = vadd.f32 %v2707_v6, %v1474_v53  ;;  %v2740_v59 = vpop.f32.mrb[31].mxu1 }
 0x32e   : > { %v1955_v19 = vadd.f32 %v2738_v4, %v1713_v63  ;;  %v2741_v21 = vadd.f32 %v2740_v59, %v2739_v0 }
 0x32f   : > { %v2708_v3 = vpop.f32.mrb[36].mxu0 }
 0x330   : > { %v1956_v58 = vadd.f32 %v2741_v21, %v1714_v36  ;;  %v2709_v13 = vpop.f32.mrb[37].mxu0 }
 0x331   : > { %v2710_v54 = vadd.f32 %v2709_v13, %v2708_v3  ;;  %v2711_v22 = vpop.f32.mrb[38].mxu0 }
 0x332   : > { %v2712_v28 = vpop.f32.mrb[39].mxu0  ;;  %v2742_v29 = vpop.f32.mrb[32].mxu1 }
 0x333   : > { %v1717_v24 = vadd.f32 %v2710_v54, %v1475_v14  ;;  %v2713_v33 = vadd.f32 %v2712_v28, %v2711_v22  ;;  %v2743_v38 = vpop.f32.mrb[33].mxu1 }
 0x334   : > { %v2744_v31 = vadd.f32 %v2743_v38, %v2742_v29  ;;  %v2745_v44 = vpop.f32.mrb[34].mxu1 }
 0x335   : > { %v1718_v2 = vadd.f32 %v2713_v33, %v1476_v39  ;;  %v2746_v52 = vpop.f32.mrb[35].mxu1 }
 0x336   : > { %v1957_v56 = vadd.f32 %v2744_v31, %v1715_v49  ;;  %v2747_v53 = vadd.f32 %v2746_v52, %v2745_v44 }
 0x337   : > { %v2770_v57 = vpop.f32.mrb[40].mxu0 }
 0x338   : > { %v1958_v62 = vadd.f32 %v2747_v53, %v1716_v17  ;;  %v2771_v55 = vpop.f32.mrb[41].mxu0 }
 0x339   : > { %v2772_v5 = vadd.f32 %v2771_v55, %v2770_v57  ;;  %v2773_v40 = vpop.f32.mrb[42].mxu0 }
 0x33a   : > { %v2748_v41 = vpop.f32.mrb[36].mxu1  ;;  %v2774_v18 = vpop.f32.mrb[43].mxu0 }
 0x33b   : > { %v2195_v46 = vadd.f32 %v2772_v5, %v1953_v51  ;;  %v2775_v27 = vadd.f32 %v2774_v18, %v2773_v40  ;;  %v2749_v50 = vpop.f32.mrb[37].mxu1 }
 0x33c   : > { %v2750_v32 = vadd.f32 %v2749_v50, %v2748_v41  ;;  %v2751_v34 = vpop.f32.mrb[38].mxu1 }
 0x33d   : > { %2219 = vst [vmem:[%s4015_s11] sm:$0xff] %v2195_v46  ;;  %v2196_v25 = vadd.f32 %v2775_v27, %v1954_v60  ;;  %v2752_v20 = vpop.f32.mrb[39].mxu1  ;;  %v2235_v48 = vmul.f32 %v2195_v46, %v2195_v46 }
 0x33e   : > { %v1959_v14 = vadd.f32 %v2750_v32, %v1717_v24  ;;  %v2753_v26 = vadd.f32 %v2752_v20, %v2751_v34 }
 0x33f   : > { %2220 = vst [vmem:[%s4015_s11 + $0x8] sm:$0xff] %v2196_v25  ;;  %v2227_v39 = vadd.f32 %v2196_v25, %v2195_v46  ;;  %v2236_v12 = vmul.f32 %v2196_v25, %v2196_v25  ;;  %v2776_v45 = vpop.f32.mrb[44].mxu0 }
 0x340   : > { %v1960_v10 = vadd.f32 %v2753_v26, %v1718_v2  ;;  %v2777_v35 = vpop.f32.mrb[45].mxu0 }
 0x341   : > { %v2243_v23 = vadd.f32 %v2236_v12, %v2235_v48  ;;  %v2778_v63 = vadd.f32 %v2777_v35, %v2776_v45  ;;  %v2779_v11 = vpop.f32.mrb[46].mxu0 }
 0x342   : > { %v2780_v7 = vpop.f32.mrb[47].mxu0  ;;  %v2782_v8 = vpop.f32.mrb[40].mxu1 }
 0x343   : > { %v2197_v9 = vadd.f32 %v2778_v63, %v1955_v19  ;;  %v2781_v36 = vadd.f32 %v2780_v7, %v2779_v11  ;;  %v2783_v30 = vpop.f32.mrb[41].mxu1 }
 0x344   : > { %v2784_v51 = vadd.f32 %v2783_v30, %v2782_v8  ;;  %v2785_v15 = vpop.f32.mrb[42].mxu1 }
 0x345   : > { %2221 = vst [vmem:[%s4015_s11 + $0x10] sm:$0xff] %v2197_v9  ;;  %v2228_v16 = vadd.f32 %v2227_v39, %v2197_v9  ;;  %v2237_v60 = vmul.f32 %v2197_v9, %v2197_v9  ;;  %v2198_v37 = vadd.f32 %v2781_v36, %v1956_v58  ;;  %v2786_v43 = vpop.f32.mrb[43].mxu1 }
 0x346   : > { %v2199_v61 = vadd.f32 %v2784_v51, %v1957_v56  ;;  %v2787_v47 = vadd.f32 %v2786_v43, %v2785_v15 }
 0x347   : > { %v2244_v1 = vadd.f32 %v2243_v23, %v2237_v60  ;;  %2222 = vst [vmem:[%s4015_s11 + $0x18] sm:$0xff] %v2198_v37  ;;  %v2229_v49 = vadd.f32 %v2228_v16, %v2198_v37  ;;  %v2238_v6 = vmul.f32 %v2198_v37, %v2198_v37 }
 0x348   : > { %2223 = vst [vmem:[%s4015_s11 + $0x20] sm:$0xff] %v2199_v61  ;;  %v2239_v42 = vmul.f32 %v2199_v61, %v2199_v61  ;;  %v2200_v4 = vadd.f32 %v2787_v47, %v1958_v62 }
 0x349   : > { %v2245_v0 = vadd.f32 %v2244_v1, %v2238_v6  ;;  %v2230_v17 = vadd.f32 %v2229_v49, %v2199_v61 }
 0x34a   : > { %2224 = vst [vmem:[%s4015_s11 + $0x28] sm:$0xff] %v2200_v4  ;;  %v2240_v59 = vmul.f32 %v2200_v4, %v2200_v4  ;;  %v2788_v19 = vpop.f32.mrb[44].mxu1 }
 0x34b   : > { %v2246_v21 = vadd.f32 %v2245_v0, %v2239_v42  ;;  %v2231_v3 = vadd.f32 %v2230_v17, %v2200_v4  ;;  %v2789_v58 = vpop.f32.mrb[45].mxu1 }
 0x34c   : > { %v2790_v13 = vadd.f32 %v2789_v58, %v2788_v19  ;;  %v2791_v54 = vpop.f32.mrb[46].mxu1 }
 0x34d   : > { %v2247_v22 = vadd.f32 %v2246_v21, %v2240_v59  ;;  %v2792_v28 = vpop.f32.mrb[47].mxu1 }
 0x34e   : > { %v2201_v29 = vadd.f32 %v2790_v13, %v1959_v14  ;;  %v2793_v24 = vadd.f32 %v2792_v28, %v2791_v54 }
 0x350   : > { %2225 = vst [vmem:[%s4015_s11 + $0x30] sm:$0xff] %v2201_v29  ;;  %v2232_v33 = vadd.f32 %v2231_v3, %v2201_v29  ;;  %v2241_v38 = vmul.f32 %v2201_v29, %v2201_v29  ;;  %v2202_v31 = vadd.f32 %v2793_v24, %v1960_v10 }
 0x352   : > { %v2248_v44 = vadd.f32 %v2247_v22, %v2241_v38  ;;  %2226 = vst [vmem:[%s4015_s11 + $0x38] sm:$0xff] %v2202_v31  ;;  %v2233_v2 = vadd.f32 %v2232_v33, %v2202_v31  ;;  %v2242_v52 = vmul.f32 %v2202_v31, %v2202_v31  ;;  %s3137_s11 = scalar_lea.vmem %s3136_s30, 2048 }
 0x353   : > { %p3139_p7 = scmp.lt.s32.totalorder %s3137_s11, %s3131_s19 }
 0x355   : > { %p3140_p10 = por %p3139_p7, %p3138_p3 }
 0x357   : > { %p3141_p13 = pnand %p3140_p10, %p3134_p8 }
 0x359   : > { %3144 = shalt.err (!%p3141_p13)
}
 0x35a   : > { %s3145_s8 = scalar_lea.hbm %s4036_s27, 1024  ;;  %s3149_s13 = scalar_lea.hbm %s4161_s4, 2048 }
 0x35b   : > { %p3146_p0 = scmp.ne.s32.totalorder %s4036_s27, %s3145_s8  ;;  %p3150_p11 = scmp.lt.u32.totalorder %s4036_s27, %s4161_s4 }
 0x35c   : > { %p3151_p12 = scmp.lt.u32.totalorder %s3149_s13, %s3145_s8  ;;  %p3153_p1 = scmp.lt.u32.totalorder %s3145_s8, %s4036_s27 }
 0x35d   : > { %p3147_p5 = pnand %p3146_p0, %p3462_p6 }
 0x35e   : > { %p3152_p2 = por %p3151_p12, %p3150_p11 }
 0x35f   : > { %p3148_p9 = pneg %p3147_p5 }
 0x360   : > { %p3154_p4 = por %p3153_p1, %p3152_p2 }
 0x362   : > { %p3155_p8 = pnand %p3154_p4, %p3148_p9 }
 0x364   : > { %3158 = shalt.err (!%p3155_p8)
}
 0x365   : > { %s3280_s19 = smov 128   ;;  %s3281_s12 = smov 8   ;;  %v2249_v56 = vadd.f32 %v2248_v44, %v2242_v52  ;;  %2234 = vst [vmem:[%s4030_s7] sm:$0xff] %v2233_v2 }
 0x366   : > { %s4198_s17 = scalar_lea.sflag [#allocation7], %s3513_s26  ;;  %s4199_s11 = sshll.u32 %s3340_s25, 7 }
 0x367   : > { %2846 = dma.vmem_to_hbm [thread:$0]  (%p3462_p6), %s4025_s14, 1024, %s4036_s27, %s4198_s17, %s3280_s19, %s3280_s19, %s3281_s12  }
 0x368   : > { %s4082_s13 = scalar_lea.hbm %s4163_s6, %s4199_s11  ;;  %s4200_s30 = sshll.u32 %s4039_s29, 4  ;;  %s4086_s30 = int_to_ptr.vmem [resolvable:$true] %s4200_s30 }
 0x369   : > { %s4201_s0 = sand.u32 1, %s3340_s25   ;;  %s3159_s2 = scalar_lea.vmem %s4050_s20, 128 }
 0x36a   : > { %s4090_s1 = scalar_lea.sflag [#allocation15], %s4201_s0  ;;  %p3160_p3 = scmp.ne.s32.totalorder %s4050_s20, %s3159_s2 }
 0x36b   : > { %s3282_s26 = smov [#allocation14]  }
 0x36c   : > { %p3161_p7 = pnand %p3160_p3, %p3462_p6  ;;  %s3163_s14 = sshll.u32 %s3282_s26, 4  ;;  %s3164_s14 = int_to_ptr.vmem [resolvable:$false] %s3163_s14 }
 0x36d   : > { %s3165_s7 = scalar_lea.vmem %s3164_s14, 256  ;;  %p3166_p13 = scmp.lt.s32.totalorder %s4050_s20, %s3164_s14 }
 0x36e   : > { %p3162_p10 = pneg %p3161_p7  ;;  %p3167_p0 = scmp.lt.s32.totalorder %s3165_s7, %s3159_s2 }
 0x370   : > { %p3168_p5 = por %p3167_p0, %p3166_p13 }
 0x372   : > { %p3169_p9 = pnand %p3168_p5, %p3162_p10 }
 0x374   : > { %3172 = shalt.err (!%p3169_p9)
}
 0x375   : > { %s3173_s0 = scalar_lea.hbm %s4048_s10, 128  ;;  %s3177_s19 = scalar_lea.hbm %s4162_s5, 256 }
 0x376   : > { %p3174_p11 = scmp.ne.s32.totalorder %s4048_s10, %s3173_s0  ;;  %p3178_p1 = scmp.lt.u32.totalorder %s4048_s10, %s4162_s5 }
 0x377   : > { %p3179_p4 = scmp.lt.u32.totalorder %s3177_s19, %s3173_s0  ;;  %p3181_p3 = scmp.lt.u32.totalorder %s3173_s0, %s4048_s10 }
 0x378   : > { %p3175_p12 = pnand %p3174_p11, %p3462_p6 }
 0x379   : > { %p3180_p8 = por %p3179_p4, %p3178_p1 }
 0x37a   : > { %p3176_p2 = pneg %p3175_p12 }
 0x37b   : > { %p3182_p7 = por %p3181_p3, %p3180_p8 }
 0x37d   : > { %p3183_p10 = pnand %p3182_p7, %p3176_p2 }
 0x37f   : > { %3186 = shalt.err (!%p3183_p10)
}
 0x380   : > { %2847 = dma.vmem_to_hbm [thread:$0]  (%p3462_p6), %s4050_s20, 128, %s4048_s10, %s4090_s1   ;;  %2250 = vst [vmem:[%s4039_s29] sm:$0xff] %v2249_v56 }
 0x381   : > { %s3187_s2 = scalar_lea.vmem %s4086_s30, 128  ;;  %s3283_s11 = smov [#allocation16]  }
 0x382   : > { %p3188_p13 = scmp.ne.s32.totalorder %s4086_s30, %s3187_s2  ;;  %s3191_s8 = sshll.u32 %s3283_s11, 4  ;;  %s3192_s8 = int_to_ptr.vmem [resolvable:$false] %s3191_s8 }
 0x383   : > { %s3193_s9 = scalar_lea.vmem %s3192_s8, 256  ;;  %p3194_p9 = scmp.lt.s32.totalorder %s4086_s30, %s3192_s8 }
 0x384   : > { %p3189_p0 = pnand %p3188_p13, %p3462_p6  ;;  %p3195_p11 = scmp.lt.s32.totalorder %s3193_s9, %s3187_s2 }
 0x386   : > { %p3190_p5 = pneg %p3189_p0  ;;  %p3196_p12 = por %p3195_p11, %p3194_p9 }
 0x388   : > { %p3197_p2 = pnand %p3196_p12, %p3190_p5 }
 0x38a   : > { %3200 = shalt.err (!%p3197_p2)
}
 0x38b   : > { %s3201_s20 = scalar_lea.hbm %s4082_s13, 128  ;;  %s3205_s26 = scalar_lea.hbm %s4163_s6, 256 }
 0x38c   : > { %p3202_p1 = scmp.ne.s32.totalorder %s4082_s13, %s3201_s20  ;;  %p3206_p3 = scmp.lt.u32.totalorder %s4082_s13, %s4163_s6 }
 0x38d   : > { %p3207_p7 = scmp.lt.u32.totalorder %s3205_s26, %s3201_s20  ;;  %p3209_p13 = scmp.lt.u32.totalorder %s3201_s20, %s4082_s13 }
 0x38e   : > { %p3203_p4 = pnand %p3202_p1, %p3462_p6 }
 0x38f   : > { %p3208_p10 = por %p3207_p7, %p3206_p3 }
 0x390   : > { %p3204_p8 = pneg %p3203_p4 }
 0x391   : > { %p3210_p0 = por %p3209_p13, %p3208_p10 }
 0x393   : > { %p3211_p5 = pnand %p3210_p0, %p3204_p8 }
 0x395   : > { %3214 = shalt.err (!%p3211_p5)
}
 0x396   : > { %2848 = dma.vmem_to_hbm [thread:$0]  (%p3462_p6), %s4086_s30, 128, %s4082_s13, %s4090_s1  }
 0x397 PF: > { %s2316_s0 = sand.u32 1, %s3253_s21   ;;  %p4202_p9 = scmp.ne.s32.totalorder %s4178_s28, 0 }
 0x398   : > { %p4203_p11 = scmp.ge.s32.totalorder %s3265_s24, 2  ;;  %s2317_s25 = scalar_lea.sflag [#allocation7], %s2316_s0 }
 0x39a   : > { %p2867_p12 = pnand %p4203_p11, %p4202_p9 }
 0x39c   : > { %3244 = dma.done.wait (!%p2867_p12), %s2317_s25, 1024  }
 0x39d   : > { %3246 = vsyncadd (!%p2867_p12), %s2317_s25, 4294966272  ;;  %s4204_s27 = sadd.s32 4294967294, %s3265_s24  }
 0x39e   : > { %s2325_s19 = sand.u32 1, %s4204_s27  }
 0x39f   : > { %s2326_s12 = scalar_lea.sflag [#allocation15], %s2325_s19 }
 0x3a0   : > { %3248 = dma.done.wait (!%p2867_p12), %s2326_s12, 256  }
 0x3a1   : > { %3250 = vsyncadd (!%p2867_p12), %s2326_s12, 4294967040  ;;  %p25_p6 = scmp.ge.s32.totalorder %s3448_s18, 4   ;;  %s4205_s21 = smov %s3257_s22 }
 0x3a2   : > { %s4206_s22 = smov %s3261_s23  ;;  %s4207_s23 = smov %s3458_s15 }
 0x3a3   : > { %s4208_s24 = smov %s3448_s18  ;;  %27 = sbr.rel (!%p25_p6) target bundleno = 13 (0xd), region = 129 }
 0x3aa   :  { %2340 = vsyncpa [#allocation6], 1 }
 0x3ab   :  { %2342 = vsyncpa [#allocation6 + $0x1], 1 }
 0x3ac   :  { %2343 = vsyncpa [#allocation9], 1 }
 0x3ad   :  { %2344 = vsyncpa [#allocation12], 1 }
 0x3ae   :  { %2345 = vsyncpa [#allocation7], 1 }
 0x3af   :  { %2347 = vsyncpa [#allocation7 + $0x1], 1 }
 0x3b0   :  { %2348 = vsyncpa [#allocation15], 1 }
 0x3b1   :  { %2350 = vsyncpa [#allocation15 + $0x1], 1 }

</bundles_post_ra>
